<compile_context>
chip_gen: v5e
topology: v5e:2x2
jax: 0.10.0
libtpu: 0.0.40
codegen_flags: <defaults>
</compile_context>

<pallas_src>
import functools

import jax
import jax.numpy as jnp
from jax import lax
from jax.experimental import pallas as pl
from jax.experimental.pallas import tpu as pltpu


def _round_up(x, m):
    return (x + m - 1) // m * m


def _gru_seq_kernel(x_ref,       # (S_pad, H)   embedded token sequence
                    w_ih_ref,    # (H, 3L)      W_ih^T, gate-lane-padded (r|z|n)
                    w_hh_ref,    # (L, 3L)      W_hh^T, gate-lane-padded
                    b_ih_ref,    # (1, 3L)
                    b_hh_ref,    # (1, 3L)
                    h0_ref,      # (1, L)       initial hidden (lane-padded)
                    out_ref,     # (S_pad, L)   per-step GRU outputs
                    gi_ref,      # VMEM scratch (S_pad, 3L) f32
                    *, seq_len, lanes):
    L = lanes

    # --- Prologue: ONE MXU matmul for all input projections (hoisted out of
    # the serial recurrence). ---
    gi_ref[...] = (
        jnp.dot(x_ref[...], w_ih_ref[...], preferred_element_type=jnp.float32)
        + b_ih_ref[...])

    # Padded rows [seq_len, S_pad) are never touched by the loop; zero them so
    # the single HBM writeback is deterministic.
    out_ref[...] = jnp.zeros_like(out_ref)

    w_hh = w_hh_ref[...]
    b_hh = b_hh_ref[...]

    def step(t, h):                                         # h: (1, L) f32
        gi = gi_ref[pl.ds(t, 1), :]                         # (1, 3L)
        gh = jnp.dot(h, w_hh, preferred_element_type=jnp.float32) + b_hh
        # Lane-aligned gate slices at offsets 0 / L / 2L.
        r = jax.nn.sigmoid(gi[:, 0:L] + gh[:, 0:L])                 # reset
        z = jax.nn.sigmoid(gi[:, L:2 * L] + gh[:, L:2 * L])         # update
        # PyTorch GRU semantics: n = tanh(i_n + r * (W_hn h + b_hn))
        n = jnp.tanh(gi[:, 2 * L:3 * L] + r * gh[:, 2 * L:3 * L])
        h_new = (1.0 - z) * n + z * h
        out_ref[pl.ds(t, 1), :] = h_new                     # lane-dense row
        return h_new

    # Unrolled serial recurrence; hidden state stays in vregs.
    lax.fori_loop(0, seq_len, step, h0_ref[...].astype(jnp.float32),
                  unroll=True if seq_len <= 32 else 8)


@jax.jit
def encoder_forward_sequence(tokens, hidden0, emb, w_ih_t, w_hh_t, b_ih, b_hh):
    """Run the encoder GRU over a whole token sequence in one pallas_call.

    tokens: int32[S]; hidden0: f32[1,1,H]; emb: f32[V,H];
    w_ih_t / w_hh_t: f32[H, 3H] (pre-transposed, PyTorch gate order r|z|n);
    b_ih / b_hh: f32[3H].
    Returns (outputs f32[S,1,H], hidden f32[1,1,H]) -- identical to calling
    EncoderModel.forward once per token and stacking the per-step outputs.
    """
    S = tokens.shape[0]
    V, H = emb.shape
    L = _round_up(H, 128)                  # lane-aligned per-gate width
    S_pad = _round_up(S, 8)                # sublane-aligned output rows

    # Pre-gather the embedded sequence (resident-sized table).
    x_emb = jnp.take(emb, tokens, axis=0).astype(jnp.float32)        # (S, H)
    x_emb = jnp.pad(x_emb, ((0, S_pad - S), (0, 0)))                 # (S_pad, H)

    def pad_gate_cols(w2d):                # (rows, 3H) -> (rows, 3L)
        r, z, n = jnp.split(w2d, 3, axis=-1)
        pad = ((0, 0), (0, L - H))
        return jnp.concatenate(
            [jnp.pad(r, pad), jnp.pad(z, pad), jnp.pad(n, pad)], axis=-1)

    w_ih_pad = pad_gate_cols(w_ih_t)                                  # (H, 3L)
    w_hh_pad = jnp.pad(pad_gate_cols(w_hh_t), ((0, L - H), (0, 0)))   # (L, 3L)
    b_ih_pad = pad_gate_cols(b_ih.reshape(1, 3 * H))                  # (1, 3L)
    b_hh_pad = pad_gate_cols(b_hh.reshape(1, 3 * H))                  # (1, 3L)
    h0_pad = jnp.pad(hidden0.reshape(1, H), ((0, 0), (0, L - H)))     # (1, L)

    kernel = functools.partial(_gru_seq_kernel, seq_len=S, lanes=L)

    out_pad = pl.pallas_call(
        kernel,
        out_shape=jax.ShapeDtypeStruct((S_pad, L), jnp.float32),
        grid_spec=pltpu.PrefetchScalarGridSpec(
            num_scalar_prefetch=0,
            grid=(1,),   # whole sequence in one step; recurrence is in-kernel
            in_specs=[
                pl.BlockSpec((S_pad, H), lambda i: (0, 0)),     # embedded seq
                pl.BlockSpec((H, 3 * L), lambda i: (0, 0)),     # W_ih^T (pad)
                pl.BlockSpec((L, 3 * L), lambda i: (0, 0)),     # W_hh^T (pad)
                pl.BlockSpec((1, 3 * L), lambda i: (0, 0)),     # b_ih
                pl.BlockSpec((1, 3 * L), lambda i: (0, 0)),     # b_hh
                pl.BlockSpec((1, L), lambda i: (0, 0)),         # h0
            ],
            out_specs=pl.BlockSpec((S_pad, L), lambda i: (0, 0)),
            scratch_shapes=[pltpu.VMEM((S_pad, 3 * L), jnp.float32)],
        ),
        compiler_params=pltpu.CompilerParams(
            dimension_semantics=("arbitrary",)),
    )(x_emb, w_ih_pad, w_hh_pad, b_ih_pad, b_hh_pad, h0_pad)

    outputs = out_pad[:S, :H].reshape(S, 1, H)
    hidden = out_pad[S - 1, :H].reshape(1, 1, H)    # final hidden == last row
    return outputs, hidden


def encoder_forward(token, hidden, emb, w_ih_t, w_hh_t, b_ih, b_hh):
    """Exact single-step equivalent of EncoderModel.forward(input, hidden)."""
    outputs, new_hidden = encoder_forward_sequence(
        token.reshape(1).astype(jnp.int32), hidden,
        emb, w_ih_t, w_hh_t, b_ih, b_hh)
    return outputs.reshape(1, 1, -1), new_hidden


def _reference_sequence(tokens, hidden0, emb, w_ih_t, w_hh_t, b_ih, b_hh):
    H = hidden0.shape[-1]
    h = hidden0.reshape(1, H)
    outs = []
    for t in range(tokens.shape[0]):
        x = emb[tokens[t]].reshape(1, H)
        gi = x @ w_ih_t + b_ih.reshape(1, -1)
        gh = h @ w_hh_t + b_hh.reshape(1, -1)
        i_r, i_z, i_n = gi[:, :H], gi[:, H:2 * H], gi[:, 2 * H:]
        h_r, h_z, h_n = gh[:, :H], gh[:, H:2 * H], gh[:, 2 * H:]
        r = jax.nn.sigmoid(i_r + h_r)
        z = jax.nn.sigmoid(i_z + h_z)
        n = jnp.tanh(i_n + r * h_n)
        h = (1.0 - z) * n + z * h
        outs.append(h)
    return jnp.stack(outs, axis=0), h.reshape(1, 1, H)


if __name__ == "__main__":
    INPUT_SIZE = 16   # vocab size
    HIDDEN = 32       # hidden_size
    SEQ_LEN = 8

    key = jax.random.PRNGKey(0)
    k_emb, k_wi, k_wh, k_bi, k_bh, k_tok = jax.random.split(key, 6)

    bound = 1.0 / jnp.sqrt(HIDDEN)
    # nn.Embedding default: N(0,1); nn.GRU default: U(-1/sqrt(H), 1/sqrt(H)).
    emb = jax.random.normal(k_emb, (INPUT_SIZE, HIDDEN), jnp.float32)
    # Weights stored pre-transposed: (H, 3H), PyTorch gate order [r | z | n].
    w_ih_t = jax.random.uniform(k_wi, (HIDDEN, 3 * HIDDEN), jnp.float32, -bound, bound)
    w_hh_t = jax.random.uniform(k_wh, (HIDDEN, 3 * HIDDEN), jnp.float32, -bound, bound)
    b_ih = jax.random.uniform(k_bi, (3 * HIDDEN,), jnp.float32, -bound, bound)
    b_hh = jax.random.uniform(k_bh, (3 * HIDDEN,), jnp.float32, -bound, bound)

    tokens = jax.random.randint(k_tok, (SEQ_LEN,), 0, INPUT_SIZE, dtype=jnp.int32)
    hidden0 = jnp.zeros((1, 1, HIDDEN), dtype=jnp.float32)   # EncoderModel._init_hidden()

    # Whole-sequence kernel: one pallas_call, vreg-carried hidden state.
    outs, hid = encoder_forward_sequence(tokens, hidden0, emb, w_ih_t, w_hh_t, b_ih, b_hh)
    jax.block_until_ready((outs, hid))

    ref_outs, ref_hid = _reference_sequence(tokens, hidden0, emb, w_ih_t, w_hh_t, b_ih, b_hh)
    assert outs.shape == (SEQ_LEN, 1, HIDDEN) and hid.shape == (1, 1, HIDDEN)
    assert jnp.allclose(outs, ref_outs, atol=1e-5), "sequence output mismatch vs reference"
    assert jnp.allclose(hid, ref_hid, atol=1e-5), "sequence hidden mismatch vs reference"

    # Single-step call — exact EncoderModel.forward(input, hidden) semantics.
    out1, hid1 = encoder_forward(tokens[:1], hidden0, emb, w_ih_t, w_hh_t, b_ih, b_hh)
    jax.block_until_ready((out1, hid1))
    assert out1.shape == (1, 1, HIDDEN) and hid1.shape == (1, 1, HIDDEN)
    assert jnp.allclose(out1, ref_outs[0].reshape(1, 1, HIDDEN), atol=1e-5)
    assert jnp.allclose(hid1, ref_outs[0].reshape(1, 1, HIDDEN), atol=1e-5)

    print("KERNEL_OK")
</pallas_src>

<mosaic_0001>
module attributes {stable_mosaic.version = 11 : i64} {
  func.func @_gru_seq_kernel(%arg0: i32, %arg1: memref<8x32xf32, #tpu.memory_space<vmem>>, %arg2: memref<32x384xf32, #tpu.memory_space<vmem>>, %arg3: memref<128x384xf32, #tpu.memory_space<vmem>>, %arg4: memref<1x384xf32, #tpu.memory_space<vmem>>, %arg5: memref<1x384xf32, #tpu.memory_space<vmem>>, %arg6: memref<1x128xf32, #tpu.memory_space<vmem>>, %arg7: memref<8x128xf32, #tpu.memory_space<vmem>>, %arg8: memref<8x384xf32, #tpu.memory_space<vmem>>) attributes {dimension_semantics = [#tpu.dimension_semantics<arbitrary>], iteration_bounds = array<i64: 1>, scalar_prefetch = 0 : i64, scratch_operands = 1 : i64, tpu.core_type = #tpu.core_type<tc>, window_params = [{pipeline_mode = #tpu.pipeline_mode<synchronous>, transform_indices = @transform_0, window_bounds = array<i64: 8, 32>}, {pipeline_mode = #tpu.pipeline_mode<synchronous>, transform_indices = @transform_1, window_bounds = array<i64: 32, 384>}, {pipeline_mode = #tpu.pipeline_mode<synchronous>, transform_indices = @transform_2, window_bounds = array<i64: 128, 384>}, {pipeline_mode = #tpu.pipeline_mode<synchronous>, transform_indices = @transform_3, window_bounds = array<i64: 1, 384>}, {pipeline_mode = #tpu.pipeline_mode<synchronous>, transform_indices = @transform_4, window_bounds = array<i64: 1, 384>}, {pipeline_mode = #tpu.pipeline_mode<synchronous>, transform_indices = @transform_5, window_bounds = array<i64: 1, 128>}, {pipeline_mode = #tpu.pipeline_mode<synchronous>, transform_indices = @transform_6, window_bounds = array<i64: 8, 128>}]} {
    %c0 = arith.constant 0 : index
    %c0_0 = arith.constant 0 : index
    %0 = vector.load %arg1[%c0, %c0_0] : memref<8x32xf32, #tpu.memory_space<vmem>>, vector<8x32xf32>
    %c0_1 = arith.constant 0 : index
    %c0_2 = arith.constant 0 : index
    %1 = vector.load %arg2[%c0_1, %c0_2] : memref<32x384xf32, #tpu.memory_space<vmem>>, vector<32x384xf32>
    %cst = arith.constant dense<0.000000e+00> : vector<8x384xf32>
    %2 = tpu.matmul %0, %1, %cst {dimension_numbers = #tpu.dot_dimension_numbers<[1], [0], [0], [1], [0, 0, 1, 1], [], []>} : vector<8x32xf32>, vector<32x384xf32>, vector<8x384xf32> -> vector<8x384xf32>
    %c0_3 = arith.constant 0 : index
    %c0_4 = arith.constant 0 : index
    %3 = vector.load %arg4[%c0_3, %c0_4] : memref<1x384xf32, #tpu.memory_space<vmem>>, vector<1x384xf32>
    %4 = vector.broadcast %3 : vector<1x384xf32> to vector<8x384xf32>
    %5 = arith.addf %2, %4 : vector<8x384xf32>
    %c0_5 = arith.constant 0 : index
    %c0_6 = arith.constant 0 : index
    %6 = vector.load %arg8[%c0_5, %c0_6] : memref<8x384xf32, #tpu.memory_space<vmem>>, vector<8x384xf32>
    tpu.vector_store %arg8[%c0_5, %c0_6], %5 {strides = array<i32>} : memref<8x384xf32, #tpu.memory_space<vmem>>, vector<8x384xf32>,
    %cst_7 = arith.constant 0.000000e+00 : f32
    %7 = vector.broadcast %cst_7 : f32 to vector<8x128xf32>
    %c0_8 = arith.constant 0 : index
    %c0_9 = arith.constant 0 : index
    %8 = vector.load %arg7[%c0_8, %c0_9] : memref<8x128xf32, #tpu.memory_space<vmem>>, vector<8x128xf32>
    tpu.vector_store %arg7[%c0_8, %c0_9], %7 {strides = array<i32>} : memref<8x128xf32, #tpu.memory_space<vmem>>, vector<8x128xf32>,
    %c0_10 = arith.constant 0 : index
    %c0_11 = arith.constant 0 : index
    %9 = vector.load %arg3[%c0_10, %c0_11] : memref<128x384xf32, #tpu.memory_space<vmem>>, vector<128x384xf32>
    %c0_12 = arith.constant 0 : index
    %c0_13 = arith.constant 0 : index
    %10 = vector.load %arg5[%c0_12, %c0_13] : memref<1x384xf32, #tpu.memory_space<vmem>>, vector<1x384xf32>
    %c0_14 = arith.constant 0 : index
    %c0_15 = arith.constant 0 : index
    %11 = vector.load %arg6[%c0_14, %c0_15] : memref<1x128xf32, #tpu.memory_space<vmem>>, vector<1x128xf32>
    %c0_i32 = arith.constant 0 : i32
    %12 = arith.index_cast %c0_i32 : i32 to index
    %c0_16 = arith.constant 0 : index
    %13 = vector.load %arg8[%12, %c0_16] : memref<8x384xf32, #tpu.memory_space<vmem>>, vector<1x384xf32>
    %cst_17 = arith.constant dense<0.000000e+00> : vector<1x384xf32>
    %14 = tpu.matmul %11, %9, %cst_17 {dimension_numbers = #tpu.dot_dimension_numbers<[1], [0], [0], [1], [0, 0, 1, 1], [], []>} : vector<1x128xf32>, vector<128x384xf32>, vector<1x384xf32> -> vector<1x384xf32>
    %15 = arith.addf %14, %10 : vector<1x384xf32>
    %16 = vector.extract_strided_slice %13 {offsets = [0, 0], sizes = [1, 128], strides = [1, 1]} : vector<1x384xf32> to vector<1x128xf32>
    %17 = vector.extract_strided_slice %15 {offsets = [0, 0], sizes = [1, 128], strides = [1, 1]} : vector<1x384xf32> to vector<1x128xf32>
    %18 = arith.addf %16, %17 : vector<1x128xf32>
    %19 = arith.negf %18 : vector<1x128xf32>
    %20 = math.exp %19 : vector<1x128xf32>
    %cst_18 = arith.constant 1.000000e+00 : f32
    %21 = vector.broadcast %cst_18 : f32 to vector<1x128xf32>
    %22 = arith.addf %21, %20 : vector<1x128xf32>
    %23 = arith.divf %21, %22 : vector<1x128xf32>
    %24 = vector.extract_strided_slice %13 {offsets = [0, 128], sizes = [1, 128], strides = [1, 1]} : vector<1x384xf32> to vector<1x128xf32>
    %25 = vector.extract_strided_slice %15 {offsets = [0, 128], sizes = [1, 128], strides = [1, 1]} : vector<1x384xf32> to vector<1x128xf32>
    %26 = arith.addf %24, %25 : vector<1x128xf32>
    %27 = arith.negf %26 : vector<1x128xf32>
    %28 = math.exp %27 : vector<1x128xf32>
    %cst_19 = arith.constant 1.000000e+00 : f32
    %29 = vector.broadcast %cst_19 : f32 to vector<1x128xf32>
    %30 = arith.addf %29, %28 : vector<1x128xf32>
    %31 = arith.divf %29, %30 : vector<1x128xf32>
    %32 = vector.extract_strided_slice %13 {offsets = [0, 256], sizes = [1, 128], strides = [1, 1]} : vector<1x384xf32> to vector<1x128xf32>
    %33 = vector.extract_strided_slice %15 {offsets = [0, 256], sizes = [1, 128], strides = [1, 1]} : vector<1x384xf32> to vector<1x128xf32>
    %34 = arith.mulf %23, %33 : vector<1x128xf32>
    %35 = arith.addf %32, %34 : vector<1x128xf32>
    %36 = math.tanh %35 : vector<1x128xf32>
    %cst_20 = arith.constant 1.000000e+00 : f32
    %37 = vector.broadcast %cst_20 : f32 to vector<1x128xf32>
    %38 = arith.subf %37, %31 : vector<1x128xf32>
    %39 = arith.mulf %38, %36 : vector<1x128xf32>
    %40 = arith.mulf %31, %11 : vector<1x128xf32>
    %41 = arith.addf %39, %40 : vector<1x128xf32>
    %42 = arith.index_cast %c0_i32 : i32 to index
    %c0_21 = arith.constant 0 : index
    %43 = vector.load %arg7[%42, %c0_21] : memref<8x128xf32, #tpu.memory_space<vmem>>, vector<1x128xf32>
    tpu.vector_store %arg7[%42, %c0_21], %41 {strides = array<i32>} : memref<8x128xf32, #tpu.memory_space<vmem>>, vector<1x128xf32>,
    %c1_i32 = arith.constant 1 : i32
    %44 = arith.index_cast %c1_i32 : i32 to index
    %c0_22 = arith.constant 0 : index
    %45 = vector.load %arg8[%44, %c0_22] : memref<8x384xf32, #tpu.memory_space<vmem>>, vector<1x384xf32>
    %cst_23 = arith.constant dense<0.000000e+00> : vector<1x384xf32>
    %46 = tpu.matmul %41, %9, %cst_23 {dimension_numbers = #tpu.dot_dimension_numbers<[1], [0], [0], [1], [0, 0, 1, 1], [], []>} : vector<1x128xf32>, vector<128x384xf32>, vector<1x384xf32> -> vector<1x384xf32>
    %47 = arith.addf %46, %10 : vector<1x384xf32>
    %48 = vector.extract_strided_slice %45 {offsets = [0, 0], sizes = [1, 128], strides = [1, 1]} : vector<1x384xf32> to vector<1x128xf32>
    %49 = vector.extract_strided_slice %47 {offsets = [0, 0], sizes = [1, 128], strides = [1, 1]} : vector<1x384xf32> to vector<1x128xf32>
    %50 = arith.addf %48, %49 : vector<1x128xf32>
    %51 = arith.negf %50 : vector<1x128xf32>
    %52 = math.exp %51 : vector<1x128xf32>
    %cst_24 = arith.constant 1.000000e+00 : f32
    %53 = vector.broadcast %cst_24 : f32 to vector<1x128xf32>
    %54 = arith.addf %53, %52 : vector<1x128xf32>
    %55 = arith.divf %53, %54 : vector<1x128xf32>
    %56 = vector.extract_strided_slice %45 {offsets = [0, 128], sizes = [1, 128], strides = [1, 1]} : vector<1x384xf32> to vector<1x128xf32>
    %57 = vector.extract_strided_slice %47 {offsets = [0, 128], sizes = [1, 128], strides = [1, 1]} : vector<1x384xf32> to vector<1x128xf32>
    %58 = arith.addf %56, %57 : vector<1x128xf32>
    %59 = arith.negf %58 : vector<1x128xf32>
    %60 = math.exp %59 : vector<1x128xf32>
    %cst_25 = arith.constant 1.000000e+00 : f32
    %61 = vector.broadcast %cst_25 : f32 to vector<1x128xf32>
    %62 = arith.addf %61, %60 : vector<1x128xf32>
    %63 = arith.divf %61, %62 : vector<1x128xf32>
    %64 = vector.extract_strided_slice %45 {offsets = [0, 256], sizes = [1, 128], strides = [1, 1]} : vector<1x384xf32> to vector<1x128xf32>
    %65 = vector.extract_strided_slice %47 {offsets = [0, 256], sizes = [1, 128], strides = [1, 1]} : vector<1x384xf32> to vector<1x128xf32>
    %66 = arith.mulf %55, %65 : vector<1x128xf32>
    %67 = arith.addf %64, %66 : vector<1x128xf32>
    %68 = math.tanh %67 : vector<1x128xf32>
    %cst_26 = arith.constant 1.000000e+00 : f32
    %69 = vector.broadcast %cst_26 : f32 to vector<1x128xf32>
    %70 = arith.subf %69, %63 : vector<1x128xf32>
    %71 = arith.mulf %70, %68 : vector<1x128xf32>
    %72 = arith.mulf %63, %41 : vector<1x128xf32>
    %73 = arith.addf %71, %72 : vector<1x128xf32>
    %74 = arith.index_cast %c1_i32 : i32 to index
    %c0_27 = arith.constant 0 : index
    %75 = vector.load %arg7[%74, %c0_27] : memref<8x128xf32, #tpu.memory_space<vmem>>, vector<1x128xf32>
    tpu.vector_store %arg7[%74, %c0_27], %73 {strides = array<i32>} : memref<8x128xf32, #tpu.memory_space<vmem>>, vector<1x128xf32>,
    %c2_i32 = arith.constant 2 : i32
    %76 = arith.index_cast %c2_i32 : i32 to index
    %c0_28 = arith.constant 0 : index
    %77 = vector.load %arg8[%76, %c0_28] : memref<8x384xf32, #tpu.memory_space<vmem>>, vector<1x384xf32>
    %cst_29 = arith.constant dense<0.000000e+00> : vector<1x384xf32>
    %78 = tpu.matmul %73, %9, %cst_29 {dimension_numbers = #tpu.dot_dimension_numbers<[1], [0], [0], [1], [0, 0, 1, 1], [], []>} : vector<1x128xf32>, vector<128x384xf32>, vector<1x384xf32> -> vector<1x384xf32>
    %79 = arith.addf %78, %10 : vector<1x384xf32>
    %80 = vector.extract_strided_slice %77 {offsets = [0, 0], sizes = [1, 128], strides = [1, 1]} : vector<1x384xf32> to vector<1x128xf32>
    %81 = vector.extract_strided_slice %79 {offsets = [0, 0], sizes = [1, 128], strides = [1, 1]} : vector<1x384xf32> to vector<1x128xf32>
    %82 = arith.addf %80, %81 : vector<1x128xf32>
    %83 = arith.negf %82 : vector<1x128xf32>
    %84 = math.exp %83 : vector<1x128xf32>
    %cst_30 = arith.constant 1.000000e+00 : f32
    %85 = vector.broadcast %cst_30 : f32 to vector<1x128xf32>
    %86 = arith.addf %85, %84 : vector<1x128xf32>
    %87 = arith.divf %85, %86 : vector<1x128xf32>
    %88 = vector.extract_strided_slice %77 {offsets = [0, 128], sizes = [1, 128], strides = [1, 1]} : vector<1x384xf32> to vector<1x128xf32>
    %89 = vector.extract_strided_slice %79 {offsets = [0, 128], sizes = [1, 128], strides = [1, 1]} : vector<1x384xf32> to vector<1x128xf32>
    %90 = arith.addf %88, %89 : vector<1x128xf32>
    %91 = arith.negf %90 : vector<1x128xf32>
    %92 = math.exp %91 : vector<1x128xf32>
    %cst_31 = arith.constant 1.000000e+00 : f32
    %93 = vector.broadcast %cst_31 : f32 to vector<1x128xf32>
    %94 = arith.addf %93, %92 : vector<1x128xf32>
    %95 = arith.divf %93, %94 : vector<1x128xf32>
    %96 = vector.extract_strided_slice %77 {offsets = [0, 256], sizes = [1, 128], strides = [1, 1]} : vector<1x384xf32> to vector<1x128xf32>
    %97 = vector.extract_strided_slice %79 {offsets = [0, 256], sizes = [1, 128], strides = [1, 1]} : vector<1x384xf32> to vector<1x128xf32>
    %98 = arith.mulf %87, %97 : vector<1x128xf32>
    %99 = arith.addf %96, %98 : vector<1x128xf32>
    %100 = math.tanh %99 : vector<1x128xf32>
    %cst_32 = arith.constant 1.000000e+00 : f32
    %101 = vector.broadcast %cst_32 : f32 to vector<1x128xf32>
    %102 = arith.subf %101, %95 : vector<1x128xf32>
    %103 = arith.mulf %102, %100 : vector<1x128xf32>
    %104 = arith.mulf %95, %73 : vector<1x128xf32>
    %105 = arith.addf %103, %104 : vector<1x128xf32>
    %106 = arith.index_cast %c2_i32 : i32 to index
    %c0_33 = arith.constant 0 : index
    %107 = vector.load %arg7[%106, %c0_33] : memref<8x128xf32, #tpu.memory_space<vmem>>, vector<1x128xf32>
    tpu.vector_store %arg7[%106, %c0_33], %105 {strides = array<i32>} : memref<8x128xf32, #tpu.memory_space<vmem>>, vector<1x128xf32>,
    %c3_i32 = arith.constant 3 : i32
    %108 = arith.index_cast %c3_i32 : i32 to index
    %c0_34 = arith.constant 0 : index
    %109 = vector.load %arg8[%108, %c0_34] : memref<8x384xf32, #tpu.memory_space<vmem>>, vector<1x384xf32>
    %cst_35 = arith.constant dense<0.000000e+00> : vector<1x384xf32>
    %110 = tpu.matmul %105, %9, %cst_35 {dimension_numbers = #tpu.dot_dimension_numbers<[1], [0], [0], [1], [0, 0, 1, 1], [], []>} : vector<1x128xf32>, vector<128x384xf32>, vector<1x384xf32> -> vector<1x384xf32>
    %111 = arith.addf %110, %10 : vector<1x384xf32>
    %112 = vector.extract_strided_slice %109 {offsets = [0, 0], sizes = [1, 128], strides = [1, 1]} : vector<1x384xf32> to vector<1x128xf32>
    %113 = vector.extract_strided_slice %111 {offsets = [0, 0], sizes = [1, 128], strides = [1, 1]} : vector<1x384xf32> to vector<1x128xf32>
    %114 = arith.addf %112, %113 : vector<1x128xf32>
    %115 = arith.negf %114 : vector<1x128xf32>
    %116 = math.exp %115 : vector<1x128xf32>
    %cst_36 = arith.constant 1.000000e+00 : f32
    %117 = vector.broadcast %cst_36 : f32 to vector<1x128xf32>
    %118 = arith.addf %117, %116 : vector<1x128xf32>
    %119 = arith.divf %117, %118 : vector<1x128xf32>
    %120 = vector.extract_strided_slice %109 {offsets = [0, 128], sizes = [1, 128], strides = [1, 1]} : vector<1x384xf32> to vector<1x128xf32>
    %121 = vector.extract_strided_slice %111 {offsets = [0, 128], sizes = [1, 128], strides = [1, 1]} : vector<1x384xf32> to vector<1x128xf32>
    %122 = arith.addf %120, %121 : vector<1x128xf32>
    %123 = arith.negf %122 : vector<1x128xf32>
    %124 = math.exp %123 : vector<1x128xf32>
    %cst_37 = arith.constant 1.000000e+00 : f32
    %125 = vector.broadcast %cst_37 : f32 to vector<1x128xf32>
    %126 = arith.addf %125, %124 : vector<1x128xf32>
    %127 = arith.divf %125, %126 : vector<1x128xf32>
    %128 = vector.extract_strided_slice %109 {offsets = [0, 256], sizes = [1, 128], strides = [1, 1]} : vector<1x384xf32> to vector<1x128xf32>
    %129 = vector.extract_strided_slice %111 {offsets = [0, 256], sizes = [1, 128], strides = [1, 1]} : vector<1x384xf32> to vector<1x128xf32>
    %130 = arith.mulf %119, %129 : vector<1x128xf32>
    %131 = arith.addf %128, %130 : vector<1x128xf32>
    %132 = math.tanh %131 : vector<1x128xf32>
    %cst_38 = arith.constant 1.000000e+00 : f32
    %133 = vector.broadcast %cst_38 : f32 to vector<1x128xf32>
    %134 = arith.subf %133, %127 : vector<1x128xf32>
    %135 = arith.mulf %134, %132 : vector<1x128xf32>
    %136 = arith.mulf %127, %105 : vector<1x128xf32>
    %137 = arith.addf %135, %136 : vector<1x128xf32>
    %138 = arith.index_cast %c3_i32 : i32 to index
    %c0_39 = arith.constant 0 : index
    %139 = vector.load %arg7[%138, %c0_39] : memref<8x128xf32, #tpu.memory_space<vmem>>, vector<1x128xf32>
    tpu.vector_store %arg7[%138, %c0_39], %137 {strides = array<i32>} : memref<8x128xf32, #tpu.memory_space<vmem>>, vector<1x128xf32>,
    %c4_i32 = arith.constant 4 : i32
    %140 = arith.index_cast %c4_i32 : i32 to index
    %c0_40 = arith.constant 0 : index
    %141 = vector.load %arg8[%140, %c0_40] : memref<8x384xf32, #tpu.memory_space<vmem>>, vector<1x384xf32>
    %cst_41 = arith.constant dense<0.000000e+00> : vector<1x384xf32>
    %142 = tpu.matmul %137, %9, %cst_41 {dimension_numbers = #tpu.dot_dimension_numbers<[1], [0], [0], [1], [0, 0, 1, 1], [], []>} : vector<1x128xf32>, vector<128x384xf32>, vector<1x384xf32> -> vector<1x384xf32>
    %143 = arith.addf %142, %10 : vector<1x384xf32>
    %144 = vector.extract_strided_slice %141 {offsets = [0, 0], sizes = [1, 128], strides = [1, 1]} : vector<1x384xf32> to vector<1x128xf32>
    %145 = vector.extract_strided_slice %143 {offsets = [0, 0], sizes = [1, 128], strides = [1, 1]} : vector<1x384xf32> to vector<1x128xf32>
    %146 = arith.addf %144, %145 : vector<1x128xf32>
    %147 = arith.negf %146 : vector<1x128xf32>
    %148 = math.exp %147 : vector<1x128xf32>
    %cst_42 = arith.constant 1.000000e+00 : f32
    %149 = vector.broadcast %cst_42 : f32 to vector<1x128xf32>
    %150 = arith.addf %149, %148 : vector<1x128xf32>
    %151 = arith.divf %149, %150 : vector<1x128xf32>
    %152 = vector.extract_strided_slice %141 {offsets = [0, 128], sizes = [1, 128], strides = [1, 1]} : vector<1x384xf32> to vector<1x128xf32>
    %153 = vector.extract_strided_slice %143 {offsets = [0, 128], sizes = [1, 128], strides = [1, 1]} : vector<1x384xf32> to vector<1x128xf32>
    %154 = arith.addf %152, %153 : vector<1x128xf32>
    %155 = arith.negf %154 : vector<1x128xf32>
    %156 = math.exp %155 : vector<1x128xf32>
    %cst_43 = arith.constant 1.000000e+00 : f32
    %157 = vector.broadcast %cst_43 : f32 to vector<1x128xf32>
    %158 = arith.addf %157, %156 : vector<1x128xf32>
    %159 = arith.divf %157, %158 : vector<1x128xf32>
    %160 = vector.extract_strided_slice %141 {offsets = [0, 256], sizes = [1, 128], strides = [1, 1]} : vector<1x384xf32> to vector<1x128xf32>
    %161 = vector.extract_strided_slice %143 {offsets = [0, 256], sizes = [1, 128], strides = [1, 1]} : vector<1x384xf32> to vector<1x128xf32>
    %162 = arith.mulf %151, %161 : vector<1x128xf32>
    %163 = arith.addf %160, %162 : vector<1x128xf32>
    %164 = math.tanh %163 : vector<1x128xf32>
    %cst_44 = arith.constant 1.000000e+00 : f32
    %165 = vector.broadcast %cst_44 : f32 to vector<1x128xf32>
    %166 = arith.subf %165, %159 : vector<1x128xf32>
    %167 = arith.mulf %166, %164 : vector<1x128xf32>
    %168 = arith.mulf %159, %137 : vector<1x128xf32>
    %169 = arith.addf %167, %168 : vector<1x128xf32>
    %170 = arith.index_cast %c4_i32 : i32 to index
    %c0_45 = arith.constant 0 : index
    %171 = vector.load %arg7[%170, %c0_45] : memref<8x128xf32, #tpu.memory_space<vmem>>, vector<1x128xf32>
    tpu.vector_store %arg7[%170, %c0_45], %169 {strides = array<i32>} : memref<8x128xf32, #tpu.memory_space<vmem>>, vector<1x128xf32>,
    %c5_i32 = arith.constant 5 : i32
    %172 = arith.index_cast %c5_i32 : i32 to index
    %c0_46 = arith.constant 0 : index
    %173 = vector.load %arg8[%172, %c0_46] : memref<8x384xf32, #tpu.memory_space<vmem>>, vector<1x384xf32>
    %cst_47 = arith.constant dense<0.000000e+00> : vector<1x384xf32>
    %174 = tpu.matmul %169, %9, %cst_47 {dimension_numbers = #tpu.dot_dimension_numbers<[1], [0], [0], [1], [0, 0, 1, 1], [], []>} : vector<1x128xf32>, vector<128x384xf32>, vector<1x384xf32> -> vector<1x384xf32>
    %175 = arith.addf %174, %10 : vector<1x384xf32>
    %176 = vector.extract_strided_slice %173 {offsets = [0, 0], sizes = [1, 128], strides = [1, 1]} : vector<1x384xf32> to vector<1x128xf32>
    %177 = vector.extract_strided_slice %175 {offsets = [0, 0], sizes = [1, 128], strides = [1, 1]} : vector<1x384xf32> to vector<1x128xf32>
    %178 = arith.addf %176, %177 : vector<1x128xf32>
    %179 = arith.negf %178 : vector<1x128xf32>
    %180 = math.exp %179 : vector<1x128xf32>
    %cst_48 = arith.constant 1.000000e+00 : f32
    %181 = vector.broadcast %cst_48 : f32 to vector<1x128xf32>
    %182 = arith.addf %181, %180 : vector<1x128xf32>
    %183 = arith.divf %181, %182 : vector<1x128xf32>
    %184 = vector.extract_strided_slice %173 {offsets = [0, 128], sizes = [1, 128], strides = [1, 1]} : vector<1x384xf32> to vector<1x128xf32>
    %185 = vector.extract_strided_slice %175 {offsets = [0, 128], sizes = [1, 128], strides = [1, 1]} : vector<1x384xf32> to vector<1x128xf32>
    %186 = arith.addf %184, %185 : vector<1x128xf32>
    %187 = arith.negf %186 : vector<1x128xf32>
    %188 = math.exp %187 : vector<1x128xf32>
    %cst_49 = arith.constant 1.000000e+00 : f32
    %189 = vector.broadcast %cst_49 : f32 to vector<1x128xf32>
    %190 = arith.addf %189, %188 : vector<1x128xf32>
    %191 = arith.divf %189, %190 : vector<1x128xf32>
    %192 = vector.extract_strided_slice %173 {offsets = [0, 256], sizes = [1, 128], strides = [1, 1]} : vector<1x384xf32> to vector<1x128xf32>
    %193 = vector.extract_strided_slice %175 {offsets = [0, 256], sizes = [1, 128], strides = [1, 1]} : vector<1x384xf32> to vector<1x128xf32>
    %194 = arith.mulf %183, %193 : vector<1x128xf32>
    %195 = arith.addf %192, %194 : vector<1x128xf32>
    %196 = math.tanh %195 : vector<1x128xf32>
    %cst_50 = arith.constant 1.000000e+00 : f32
    %197 = vector.broadcast %cst_50 : f32 to vector<1x128xf32>
    %198 = arith.subf %197, %191 : vector<1x128xf32>
    %199 = arith.mulf %198, %196 : vector<1x128xf32>
    %200 = arith.mulf %191, %169 : vector<1x128xf32>
    %201 = arith.addf %199, %200 : vector<1x128xf32>
    %202 = arith.index_cast %c5_i32 : i32 to index
    %c0_51 = arith.constant 0 : index
    %203 = vector.load %arg7[%202, %c0_51] : memref<8x128xf32, #tpu.memory_space<vmem>>, vector<1x128xf32>
    tpu.vector_store %arg7[%202, %c0_51], %201 {strides = array<i32>} : memref<8x128xf32, #tpu.memory_space<vmem>>, vector<1x128xf32>,
    %c6_i32 = arith.constant 6 : i32
    %204 = arith.index_cast %c6_i32 : i32 to index
    %c0_52 = arith.constant 0 : index
    %205 = vector.load %arg8[%204, %c0_52] : memref<8x384xf32, #tpu.memory_space<vmem>>, vector<1x384xf32>
    %cst_53 = arith.constant dense<0.000000e+00> : vector<1x384xf32>
    %206 = tpu.matmul %201, %9, %cst_53 {dimension_numbers = #tpu.dot_dimension_numbers<[1], [0], [0], [1], [0, 0, 1, 1], [], []>} : vector<1x128xf32>, vector<128x384xf32>, vector<1x384xf32> -> vector<1x384xf32>
    %207 = arith.addf %206, %10 : vector<1x384xf32>
    %208 = vector.extract_strided_slice %205 {offsets = [0, 0], sizes = [1, 128], strides = [1, 1]} : vector<1x384xf32> to vector<1x128xf32>
    %209 = vector.extract_strided_slice %207 {offsets = [0, 0], sizes = [1, 128], strides = [1, 1]} : vector<1x384xf32> to vector<1x128xf32>
    %210 = arith.addf %208, %209 : vector<1x128xf32>
    %211 = arith.negf %210 : vector<1x128xf32>
    %212 = math.exp %211 : vector<1x128xf32>
    %cst_54 = arith.constant 1.000000e+00 : f32
    %213 = vector.broadcast %cst_54 : f32 to vector<1x128xf32>
    %214 = arith.addf %213, %212 : vector<1x128xf32>
    %215 = arith.divf %213, %214 : vector<1x128xf32>
    %216 = vector.extract_strided_slice %205 {offsets = [0, 128], sizes = [1, 128], strides = [1, 1]} : vector<1x384xf32> to vector<1x128xf32>
    %217 = vector.extract_strided_slice %207 {offsets = [0, 128], sizes = [1, 128], strides = [1, 1]} : vector<1x384xf32> to vector<1x128xf32>
    %218 = arith.addf %216, %217 : vector<1x128xf32>
    %219 = arith.negf %218 : vector<1x128xf32>
    %220 = math.exp %219 : vector<1x128xf32>
    %cst_55 = arith.constant 1.000000e+00 : f32
    %221 = vector.broadcast %cst_55 : f32 to vector<1x128xf32>
    %222 = arith.addf %221, %220 : vector<1x128xf32>
    %223 = arith.divf %221, %222 : vector<1x128xf32>
    %224 = vector.extract_strided_slice %205 {offsets = [0, 256], sizes = [1, 128], strides = [1, 1]} : vector<1x384xf32> to vector<1x128xf32>
    %225 = vector.extract_strided_slice %207 {offsets = [0, 256], sizes = [1, 128], strides = [1, 1]} : vector<1x384xf32> to vector<1x128xf32>
    %226 = arith.mulf %215, %225 : vector<1x128xf32>
    %227 = arith.addf %224, %226 : vector<1x128xf32>
    %228 = math.tanh %227 : vector<1x128xf32>
    %cst_56 = arith.constant 1.000000e+00 : f32
    %229 = vector.broadcast %cst_56 : f32 to vector<1x128xf32>
    %230 = arith.subf %229, %223 : vector<1x128xf32>
    %231 = arith.mulf %230, %228 : vector<1x128xf32>
    %232 = arith.mulf %223, %201 : vector<1x128xf32>
    %233 = arith.addf %231, %232 : vector<1x128xf32>
    %234 = arith.index_cast %c6_i32 : i32 to index
    %c0_57 = arith.constant 0 : index
    %235 = vector.load %arg7[%234, %c0_57] : memref<8x128xf32, #tpu.memory_space<vmem>>, vector<1x128xf32>
    tpu.vector_store %arg7[%234, %c0_57], %233 {strides = array<i32>} : memref<8x128xf32, #tpu.memory_space<vmem>>, vector<1x128xf32>,
    %c7_i32 = arith.constant 7 : i32
    %236 = arith.index_cast %c7_i32 : i32 to index
    %c0_58 = arith.constant 0 : index
    %237 = vector.load %arg8[%236, %c0_58] : memref<8x384xf32, #tpu.memory_space<vmem>>, vector<1x384xf32>
    %cst_59 = arith.constant dense<0.000000e+00> : vector<1x384xf32>
    %238 = tpu.matmul %233, %9, %cst_59 {dimension_numbers = #tpu.dot_dimension_numbers<[1], [0], [0], [1], [0, 0, 1, 1], [], []>} : vector<1x128xf32>, vector<128x384xf32>, vector<1x384xf32> -> vector<1x384xf32>
    %239 = arith.addf %238, %10 : vector<1x384xf32>
    %240 = vector.extract_strided_slice %237 {offsets = [0, 0], sizes = [1, 128], strides = [1, 1]} : vector<1x384xf32> to vector<1x128xf32>
    %241 = vector.extract_strided_slice %239 {offsets = [0, 0], sizes = [1, 128], strides = [1, 1]} : vector<1x384xf32> to vector<1x128xf32>
    %242 = arith.addf %240, %241 : vector<1x128xf32>
    %243 = arith.negf %242 : vector<1x128xf32>
    %244 = math.exp %243 : vector<1x128xf32>
    %cst_60 = arith.constant 1.000000e+00 : f32
    %245 = vector.broadcast %cst_60 : f32 to vector<1x128xf32>
    %246 = arith.addf %245, %244 : vector<1x128xf32>
    %247 = arith.divf %245, %246 : vector<1x128xf32>
    %248 = vector.extract_strided_slice %237 {offsets = [0, 128], sizes = [1, 128], strides = [1, 1]} : vector<1x384xf32> to vector<1x128xf32>
    %249 = vector.extract_strided_slice %239 {offsets = [0, 128], sizes = [1, 128], strides = [1, 1]} : vector<1x384xf32> to vector<1x128xf32>
    %250 = arith.addf %248, %249 : vector<1x128xf32>
    %251 = arith.negf %250 : vector<1x128xf32>
    %252 = math.exp %251 : vector<1x128xf32>
    %cst_61 = arith.constant 1.000000e+00 : f32
    %253 = vector.broadcast %cst_61 : f32 to vector<1x128xf32>
    %254 = arith.addf %253, %252 : vector<1x128xf32>
    %255 = arith.divf %253, %254 : vector<1x128xf32>
    %256 = vector.extract_strided_slice %237 {offsets = [0, 256], sizes = [1, 128], strides = [1, 1]} : vector<1x384xf32> to vector<1x128xf32>
    %257 = vector.extract_strided_slice %239 {offsets = [0, 256], sizes = [1, 128], strides = [1, 1]} : vector<1x384xf32> to vector<1x128xf32>
    %258 = arith.mulf %247, %257 : vector<1x128xf32>
    %259 = arith.addf %256, %258 : vector<1x128xf32>
    %260 = math.tanh %259 : vector<1x128xf32>
    %cst_62 = arith.constant 1.000000e+00 : f32
    %261 = vector.broadcast %cst_62 : f32 to vector<1x128xf32>
    %262 = arith.subf %261, %255 : vector<1x128xf32>
    %263 = arith.mulf %262, %260 : vector<1x128xf32>
    %264 = arith.mulf %255, %233 : vector<1x128xf32>
    %265 = arith.addf %263, %264 : vector<1x128xf32>
    %266 = arith.index_cast %c7_i32 : i32 to index
    %c0_63 = arith.constant 0 : index
    %267 = vector.load %arg7[%266, %c0_63] : memref<8x128xf32, #tpu.memory_space<vmem>>, vector<1x128xf32>
    tpu.vector_store %arg7[%266, %c0_63], %265 {strides = array<i32>} : memref<8x128xf32, #tpu.memory_space<vmem>>, vector<1x128xf32>,
    %c8_i32 = arith.constant 8 : i32
    return
  }
  func.func @transform_0(%arg0: i32) -> (i32, i32) {
    %c0_i32 = arith.constant 0 : i32
    %c0_i32_0 = arith.constant 0 : i32
    %c0_i32_1 = arith.constant 0 : i32
    return %c0_i32, %c0_i32_0 : i32, i32
  }
  func.func @transform_1(%arg0: i32) -> (i32, i32) {
    %c0_i32 = arith.constant 0 : i32
    %c0_i32_0 = arith.constant 0 : i32
    %c0_i32_1 = arith.constant 0 : i32
    return %c0_i32, %c0_i32_0 : i32, i32
  }
  func.func @transform_2(%arg0: i32) -> (i32, i32) {
    %c0_i32 = arith.constant 0 : i32
    %c0_i32_0 = arith.constant 0 : i32
    %c0_i32_1 = arith.constant 0 : i32
    return %c0_i32, %c0_i32_0 : i32, i32
  }
  func.func @transform_3(%arg0: i32) -> (i32, i32) {
    %c0_i32 = arith.constant 0 : i32
    %c0_i32_0 = arith.constant 0 : i32
    %c0_i32_1 = arith.constant 0 : i32
    return %c0_i32, %c0_i32_0 : i32, i32
  }
  func.func @transform_4(%arg0: i32) -> (i32, i32) {
    %c0_i32 = arith.constant 0 : i32
    %c0_i32_0 = arith.constant 0 : i32
    %c0_i32_1 = arith.constant 0 : i32
    return %c0_i32, %c0_i32_0 : i32, i32
  }
  func.func @transform_5(%arg0: i32) -> (i32, i32) {
    %c0_i32 = arith.constant 0 : i32
    %c0_i32_0 = arith.constant 0 : i32
    %c0_i32_1 = arith.constant 0 : i32
    return %c0_i32, %c0_i32_0 : i32, i32
  }
  func.func @transform_6(%arg0: i32) -> (i32, i32) {
    %c0_i32 = arith.constant 0 : i32
    %c0_i32_0 = arith.constant 0 : i32
    %c0_i32_1 = arith.constant 0 : i32
    return %c0_i32, %c0_i32_0 : i32, i32
  }
}

</mosaic_0001>

<bundles_post_ra>
// kernel: encoder_forward_sequence.1
= control target key start
LH: loop header
LB: loop body
LE: loop exit
PB: predicated region body
PF: predicated region fallthrough
CT: control target
= control target key end

     0   :  { %vm44_vm0 = vcmask 261120   ;;  %s2262_s1 = inlined_call_operand.vmem [shape: f32[32,384], index: 1, kind: input, shape index: {}]   ;;  %s2263_s2 = inlined_call_operand.vmem [shape: f32[128,384], index: 2, kind: input, shape index: {}]   ;;  %s2264_s0 = inlined_call_operand.vmem [shape: f32[8,32], index: 0, kind: input, shape index: {}]   ;;  %s2265_s5 = inlined_call_operand.vmem [shape: f32[1,128], index: 5, kind: input, shape index: {}]   ;;  %s2266_s3 = inlined_call_operand.vmem [shape: f32[1,384], index: 3, kind: input, shape index: {}]   ;;  %s2267_s4 = inlined_call_operand.vmem [shape: f32[1,384], index: 4, kind: input, shape index: {}]   ;;  %s2268_s6 = inlined_call_operand.vmem [shape: f32[8,128], index: 6, kind: output, shape index: {}]  }
   0x1   :  { %v33_v0 = vld [vmem:[%s2262_s1 + $0x48] sm:$0xff]  ;;  %v30_v2 = vld [vmem:[%s2262_s1 + $0x30] sm:$0xff]  ;;  %v27_v4 = vld [vmem:[%s2262_s1 + $0x18] sm:$0xff] }
   0x2   :  { %v1282_v1 = vld [vmem:[%s2263_s2 + $0x168] sm:$0xff]  ;;  %60 = vmatpush.msra.mxu0 %v33_v0  ;;  %v1291_v3 = vld [vmem:[%s2263_s2 + $0x150] sm:$0xff]  ;;  %v1299_v5 = vld [vmem:[%s2263_s2 + $0x138] sm:$0xff] }
   0x3   :  { %170 = vmatpush.msra.mxu3 %v1282_v1  ;;  %v24_v6 = vld [vmem:[%s2262_s1] sm:$0xff]  ;;  %v1314_v8 = vld [vmem:[%s2263_s2 + $0x170] sm:$0xff]  ;;  %v35_v9 = vld [vmem:[%s2262_s1 + $0x58] sm:$0xff] }
   0x4   :  { %61 = vmatpush.msra.mxu0 %v30_v2  ;;  %v1308_v7 = vld [vmem:[%s2263_s2 + $0x120] sm:$0xff]  ;;  %v1322_v10 = vld [vmem:[%s2263_s2 + $0x108] sm:$0xff]  ;;  %100 = vmatpush.msra.mxu2 %v35_v9  ;;  %v1331_v12 = vld [vmem:[%s2263_s2 + $0x158] sm:$0xff] }
   0x5   :  { %171 = vmatpush.msra.mxu3 %v1291_v3  ;;  %v32_v11 = vld [vmem:[%s2262_s1 + $0x40] sm:$0xff]  ;;  %v29_v13 = vld [vmem:[%s2262_s1 + $0x28] sm:$0xff]  ;;  %v1340_v14 = vld [vmem:[%s2263_s2 + $0xf0] sm:$0xff] }
   0x6   :  { %62 = vmatpush.msra.mxu0 %v27_v4  ;;  %101 = vmatpush.msra.mxu2 %v32_v11  ;;  %v34_v15 = vld [vmem:[%s2262_s1 + $0x50] sm:$0xff]  ;;  %v1349_v16 = vld [vmem:[%s2263_s2 + $0x140] sm:$0xff]  ;;  %v1358_v18 = vld [vmem:[%s2263_s2 + $0xd8] sm:$0xff] }
   0x7   :  { %172 = vmatpush.msra.mxu3 %v1299_v5  ;;  %80 = vmatpush.msra.mxu1 %v34_v15  ;;  %v26_v17 = vld [vmem:[%s2262_s1 + $0x10] sm:$0xff]  ;;  %v23_v19 = vld [vmem:[%s2264_s0] sm:$0xff]  ;;  %v31_v20 = vld [vmem:[%s2262_s1 + $0x38] sm:$0xff] }
   0x8   :  { %63 = vmatpush.msra.mxu0 %v24_v6  ;;  %102 = vmatpush.msra.mxu2 %v29_v13  ;;  %v1370_v21 = vld [vmem:[%s2263_s2 + $0x128] sm:$0xff]  ;;  %v28_v22 = vld [vmem:[%s2262_s1 + $0x20] sm:$0xff]  ;;  %v1385_v24 = vld [vmem:[%s2263_s2 + $0x110] sm:$0xff] }
   0x9   :  { %173 = vmatpush.msra.mxu3 %v1308_v7  ;;  %81 = vmatpush.msra.mxu1 %v31_v20  ;;  %v1379_v23 = vld [vmem:[%s2263_s2 + $0xc0] sm:$0xff]  ;;  %v25_v25 = vld [vmem:[%s2262_s1 + $0x8] sm:$0xff]  ;;  %v1401_v27 = vld [vmem:[%s2263_s2 + $0xf8] sm:$0xff] }
   0xa   :  { %190 = vmatpush.msrb.mxu0 %v1314_v8  ;;  %103 = vmatpush.msra.mxu2 %v26_v17  ;;  %v1395_v26 = vld [vmem:[%s2263_s2 + $0xa8] sm:$0xff]  ;;  %v1407_v28 = vld [vmem:[%s2263_s2 + $0x178] sm:$0xff]  ;;  %v1413_v29 = vld [vmem:[%s2263_s2 + $0x90] sm:$0xff] }
   0xb   :  { %174 = vmatpush.msra.mxu3 %v1322_v10  ;;  %1094 = vmatmul.msk.f32.vlgmr.msra.gmra.mxu2 %vm44_vm0, %v23_v19  ;;  %v1419_v30 = vld [vmem:[%s2263_s2 + $0xe0] sm:$0xff]  ;;  %v1431_v32 = vld [vmem:[%s2263_s2 + $0x78] sm:$0xff]  ;;  %v1438_v33 = vld [vmem:[%s2263_s2 + $0xc8] sm:$0xff] }
   0xc   :  { %191 = vmatpush.msrb.mxu0 %v1331_v12  ;;  %82 = vmatpush.msra.mxu1 %v28_v22  ;;  %v1425_v31 = vld [vmem:[%s2263_s2 + $0x160] sm:$0xff]  ;;  %v1443_v34 = vld [vmem:[%s2263_s2 + $0x148] sm:$0xff]  ;;  %v1457_v36 = vld [vmem:[%s2263_s2 + $0xb0] sm:$0xff] }
   0xd   :  { %175 = vmatpush.msra.mxu3 %v1340_v14  ;;  %1092 = vmatmul.msk.f32.vlgmr.msra.gmra.mxu0 %vm44_vm0, %v23_v19  ;;  %v1450_v35 = vld [vmem:[%s2263_s2 + $0x60] sm:$0xff]  ;;  %v1462_v37 = vld [vmem:[%s2263_s2 + $0x130] sm:$0xff]  ;;  %v1469_v38 = vld [vmem:[%s2263_s2 + $0x48] sm:$0xff] }
   0xe   :  { %192 = vmatpush.msrb.mxu0 %v1349_v16  ;;  %83 = vmatpush.msra.mxu1 %v25_v25  ;;  %v1476_v39 = vld [vmem:[%s2263_s2 + $0x98] sm:$0xff]  ;;  %v1488_v41 = vld [vmem:[%s2263_s2 + $0x30] sm:$0xff]  ;;  %v1495_v42 = vld [vmem:[%s2263_s2 + $0x80] sm:$0xff] }
   0xf   :  { %176 = vmatpush.msra.mxu3 %v1358_v18  ;;  %1093 = vmatmul.msk.f32.vlgmr.msra.gmra.mxu1 %vm44_vm0, %v23_v19  ;;  %v1481_v40 = vld [vmem:[%s2263_s2 + $0x118] sm:$0xff]  ;;  %2291 = vst [vmem:[#allocation3_spill] sm:$0xff] %v1488_v41  ;;  %v1500_v43 = vld [vmem:[%s2263_s2 + $0x100] sm:$0xff]  ;;  %v1514_v45 = vld [vmem:[%s2263_s2 + $0x68] sm:$0xff] }
  0x10   :  { %193 = vmatpush.msrb.mxu0 %v1370_v21  ;;  %210 = vmatpush.msrb.mxu1 %v1407_v28  ;;  %v1507_v44 = vld [vmem:[%s2263_s2 + $0x18] sm:$0xff]  ;;  %v1519_v46 = vld [vmem:[%s2263_s2 + $0xe8] sm:$0xff]  ;;  %v1526_v47 = vld [vmem:[%s2263_s2] sm:$0xff] }
  0x11   :  { %177 = vmatpush.msra.mxu3 %v1379_v23  ;;  %285 = vmatpush.msrb.mxu2 %v1282_v1  ;;  %2292 = vst [vmem:[#allocation4_spill] sm:$0xff] %v1507_v44  ;;  %v1533_v48 = vld [vmem:[%s2265_s5] sm:$0x1]  ;;  %v1538_v49 = vld [vmem:[%s2263_s2 + $0x50] sm:$0xff]  ;;  %v1552_v51 = vld [vmem:[%s2263_s2 + $0x38] sm:$0xff] }
  0x12   :  { %194 = vmatpush.msrb.mxu0 %v1385_v24  ;;  %211 = vmatpush.msrb.mxu1 %v1425_v31  ;;  %2293 = vst [vmem:[#allocation5_spill] sm:$0xff] %v1526_v47  ;;  %v1546_v50 = vld [vmem:[%s2263_s2 + $0xd0] sm:$0xff]  ;;  %v1560_v52 = vld [vmem:[%s2263_s2 + $0xb8] sm:$0xff]  ;;  %v1565_v53 = vld [vmem:[%s2263_s2 + $0x20] sm:$0xff] }
  0x13   :  { %178 = vmatpush.msra.mxu3 %v1395_v26  ;;  %286 = vmatpush.msrb.mxu2 %v1291_v3  ;;  %2294 = vst [vmem:[#allocation6_spill] sm:$0xff] %v1552_v51  ;;  %v1573_v54 = vld [vmem:[%s2263_s2 + $0xa0] sm:$0xff]  ;;  %v1579_v55 = vld [vmem:[%s2263_s2 + $0x8] sm:$0xff]  ;;  %v1596_v57 = vld [vmem:[%s2263_s2 + $0x70] sm:$0xff] }
  0x14   :  { %195 = vmatpush.msrb.mxu0 %v1401_v27  ;;  %212 = vmatpush.msrb.mxu1 %v1443_v34  ;;  %2295 = vst [vmem:[#allocation7_spill] sm:$0xff] %v1565_v53  ;;  %v1587_v56 = vld [vmem:[%s2263_s2 + $0x88] sm:$0xff]  ;;  %v1604_v58 = vld [vmem:[%s2263_s2 + $0x58] sm:$0xff]  ;;  %v1613_v59 = vld [vmem:[%s2263_s2 + $0x40] sm:$0xff] }
  0x15   :  { %179 = vmatpush.msra.mxu3 %v1413_v29  ;;  %287 = vmatpush.msrb.mxu2 %v1299_v5  ;;  %2296 = vst [vmem:[#allocation8_spill] sm:$0xff] %v1579_v55  ;;  %v1622_v60 = vld [vmem:[%s2263_s2 + $0x28] sm:$0xff]  ;;  %v1631_v61 = vld [vmem:[%s2263_s2 + $0x10] sm:$0xff]  ;;  %v36_v62 = vld [vmem:[%s2266_s3] sm:$0x7] }
  0x16   :  { %196 = vmatpush.msrb.mxu0 %v1419_v30  ;;  %213 = vmatpush.msrb.mxu1 %v1462_v37  ;;  %2297 = vst [vmem:[#allocation9_spill] sm:$0xff] %v1613_v59  ;;  %v38_v63 = vperm.slane %v36_v62, 0  ;;  %v39_v0 = vperm.slane %v36_v62, 1  ;;  %v40_v6 = vperm.slane %v36_v62, 2  ;;  %v160_v17 = vld [vmem:[%s2267_s4] sm:$0x7] }
  0x17   :  { %180 = vmatpush.msra.mxu3 %v1431_v32  ;;  %288 = vmatpush.msrb.mxu2 %v1308_v7  ;;  %2298 = vst [vmem:[#allocation10_spill] sm:$0xff] %v1622_v60  ;;  %v1748_v20 = vperm.slane %v160_v17, 0  ;;  %v1750_v22 = vperm.slane %v160_v17, 1 }
  0x18   :  { %197 = vmatpush.msrb.mxu0 %v1438_v33  ;;  %214 = vmatpush.msrb.mxu1 %v1481_v40  ;;  %2299 = vst [vmem:[#allocation11_spill] sm:$0xff] %v1631_v61 }
  0x19   :  { %181 = vmatpush.msra.mxu3 %v1450_v35  ;;  %289 = vmatpush.msrb.mxu2 %v1322_v10  ;;  %2300 = vst [vmem:[#allocation12_spill] sm:$0xff] %v1748_v20 }
  0x1a   :  { %198 = vmatpush.msrb.mxu0 %v1457_v36  ;;  %215 = vmatpush.msrb.mxu1 %v1500_v43  ;;  %2301 = vst [vmem:[#allocation13_spill] sm:$0xff] %v1750_v22 }
  0x1b   :  { %182 = vmatpush.msra.mxu3 %v1469_v38  ;;  %290 = vmatpush.msrb.mxu2 %v1340_v14 }
  0x1c   :  { %199 = vmatpush.msrb.mxu0 %v1476_v39  ;;  %216 = vmatpush.msrb.mxu1 %v1519_v46 }
  0x1d   :  { %183 = vmatpush.msra.mxu3 %v1488_v41  ;;  %291 = vmatpush.msrb.mxu2 %v1358_v18 }
  0x1e   :  { %200 = vmatpush.msrb.mxu0 %v1495_v42  ;;  %217 = vmatpush.msrb.mxu1 %v1546_v50 }
  0x1f   :  { %184 = vmatpush.msra.mxu3 %v1507_v44  ;;  %292 = vmatpush.msrb.mxu2 %v1379_v23 }
  0x20   :  { %201 = vmatpush.msrb.mxu0 %v1514_v45  ;;  %218 = vmatpush.msrb.mxu1 %v1560_v52 }
  0x21   :  { %185 = vmatpush.msra.mxu3 %v1526_v47  ;;  %293 = vmatpush.msrb.mxu2 %v1395_v26 }
  0x22   :  { %186 = vmatmul.f32.vlgmr.msra.gmra.mxu3 %v1533_v48  ;;  %202 = vmatpush.msrb.mxu0 %v1538_v49 }
  0x23   :  { %305 = vmatpush.msrb.mxu3 %v1314_v8  ;;  %219 = vmatpush.msrb.mxu1 %v1573_v54 }
  0x24   :  { %203 = vmatpush.msrb.mxu0 %v1552_v51  ;;  %294 = vmatpush.msrb.mxu2 %v1413_v29 }
  0x25   :  { %306 = vmatpush.msrb.mxu3 %v1331_v12  ;;  %220 = vmatpush.msrb.mxu1 %v1587_v56 }
  0x26   :  { %204 = vmatpush.msrb.mxu0 %v1565_v53  ;;  %295 = vmatpush.msrb.mxu2 %v1431_v32 }
  0x27   :  { %307 = vmatpush.msrb.mxu3 %v1349_v16  ;;  %221 = vmatpush.msrb.mxu1 %v1596_v57 }
  0x28   :  { %205 = vmatpush.msrb.mxu0 %v1579_v55  ;;  %296 = vmatpush.msrb.mxu2 %v1450_v35 }
  0x29   :  { %206 = vmatmul.f32.vlgmr.msrb.gmra.mxu0 %v1533_v48  ;;  %308 = vmatpush.msrb.mxu3 %v1370_v21 }
  0x2a   :  { %325 = vmatpush.msra.mxu0 %v1407_v28  ;;  %222 = vmatpush.msrb.mxu1 %v1604_v58 }
  0x2b   :  { %309 = vmatpush.msrb.mxu3 %v1385_v24  ;;  %297 = vmatpush.msrb.mxu2 %v1469_v38 }
  0x2c   :  { %326 = vmatpush.msra.mxu0 %v1425_v31  ;;  %223 = vmatpush.msrb.mxu1 %v1613_v59 }
  0x2d   :  { %310 = vmatpush.msrb.mxu3 %v1401_v27  ;;  %298 = vmatpush.msrb.mxu2 %v1488_v41 }
  0x2e   :  { %327 = vmatpush.msra.mxu0 %v1443_v34  ;;  %224 = vmatpush.msrb.mxu1 %v1622_v60 }
  0x2f   :  { %311 = vmatpush.msrb.mxu3 %v1419_v30  ;;  %299 = vmatpush.msrb.mxu2 %v1507_v44 }
  0x30   :  { %328 = vmatpush.msra.mxu0 %v1462_v37  ;;  %225 = vmatpush.msrb.mxu1 %v1631_v61 }
  0x31   :  { %312 = vmatpush.msrb.mxu3 %v1438_v33  ;;  %226 = vmatmul.f32.vlgmr.msrb.gmra.mxu1 %v1533_v48 }
  0x32   :  { %329 = vmatpush.msra.mxu0 %v1481_v40  ;;  %300 = vmatpush.msrb.mxu2 %v1526_v47 }
  0x33   :  { %313 = vmatpush.msrb.mxu3 %v1457_v36  ;;  %400 = vmatpush.msra.mxu1 %v1282_v1 }
  0x34   :  { %330 = vmatpush.msra.mxu0 %v1500_v43  ;;  %420 = vmatpush.msra.mxu2 %v1314_v8 }
  0x35   :  { %314 = vmatpush.msrb.mxu3 %v1476_v39  ;;  %401 = vmatpush.msra.mxu1 %v1291_v3 }
  0x36   :  { %331 = vmatpush.msra.mxu0 %v1519_v46  ;;  %421 = vmatpush.msra.mxu2 %v1331_v12 }
  0x37   :  { %315 = vmatpush.msrb.mxu3 %v1495_v42  ;;  %402 = vmatpush.msra.mxu1 %v1299_v5 }
  0x38   :  { %332 = vmatpush.msra.mxu0 %v1546_v50  ;;  %422 = vmatpush.msra.mxu2 %v1349_v16 }
  0x39   :  { %316 = vmatpush.msrb.mxu3 %v1514_v45  ;;  %403 = vmatpush.msra.mxu1 %v1308_v7 }
  0x3a   :  { %333 = vmatpush.msra.mxu0 %v1560_v52  ;;  %423 = vmatpush.msra.mxu2 %v1370_v21 }
  0x3b   :  { %317 = vmatpush.msrb.mxu3 %v1538_v49  ;;  %404 = vmatpush.msra.mxu1 %v1322_v10 }
  0x3c   :  { %334 = vmatpush.msra.mxu0 %v1573_v54  ;;  %424 = vmatpush.msra.mxu2 %v1385_v24 }
  0x3d   :  { %318 = vmatpush.msrb.mxu3 %v1552_v51  ;;  %405 = vmatpush.msra.mxu1 %v1340_v14 }
  0x3e   :  { %335 = vmatpush.msra.mxu0 %v1587_v56  ;;  %425 = vmatpush.msra.mxu2 %v1401_v27 }
  0x3f   :  { %319 = vmatpush.msrb.mxu3 %v1565_v53  ;;  %406 = vmatpush.msra.mxu1 %v1358_v18 }
  0x40   :  { %336 = vmatpush.msra.mxu0 %v1596_v57  ;;  %426 = vmatpush.msra.mxu2 %v1419_v30 }
  0x41   :  { %320 = vmatpush.msrb.mxu3 %v1579_v55  ;;  %407 = vmatpush.msra.mxu1 %v1379_v23 }
  0x42   :  { %337 = vmatpush.msra.mxu0 %v1604_v58  ;;  %427 = vmatpush.msra.mxu2 %v1438_v33 }
  0x43   :  { %440 = vmatpush.msra.mxu3 %v1407_v28  ;;  %408 = vmatpush.msra.mxu1 %v1395_v26 }
  0x44   :  { %338 = vmatpush.msra.mxu0 %v1613_v59  ;;  %428 = vmatpush.msra.mxu2 %v1457_v36 }
  0x45   :  { %441 = vmatpush.msra.mxu3 %v1425_v31  ;;  %409 = vmatpush.msra.mxu1 %v1413_v29 }
  0x46   :  { %339 = vmatpush.msra.mxu0 %v1622_v60  ;;  %429 = vmatpush.msra.mxu2 %v1476_v39 }
  0x47   :  { %442 = vmatpush.msra.mxu3 %v1443_v34  ;;  %410 = vmatpush.msra.mxu1 %v1431_v32 }
  0x48   :  { %340 = vmatpush.msra.mxu0 %v1631_v61  ;;  %430 = vmatpush.msra.mxu2 %v1495_v42 }
  0x49   :  { %443 = vmatpush.msra.mxu3 %v1462_v37  ;;  %411 = vmatpush.msra.mxu1 %v1450_v35 }
  0x4a   :  { %515 = vmatpush.msrb.mxu0 %v1282_v1  ;;  %431 = vmatpush.msra.mxu2 %v1514_v45 }
  0x4b   :  { %444 = vmatpush.msra.mxu3 %v1481_v40  ;;  %412 = vmatpush.msra.mxu1 %v1469_v38 }
  0x4c   :  { %516 = vmatpush.msrb.mxu0 %v1291_v3  ;;  %432 = vmatpush.msra.mxu2 %v1538_v49 }
  0x4d   :  { %445 = vmatpush.msra.mxu3 %v1500_v43  ;;  %413 = vmatpush.msra.mxu1 %v1488_v41 }
  0x4e   :  { %517 = vmatpush.msrb.mxu0 %v1299_v5  ;;  %433 = vmatpush.msra.mxu2 %v1552_v51 }
  0x4f   :  { %446 = vmatpush.msra.mxu3 %v1519_v46  ;;  %414 = vmatpush.msra.mxu1 %v1507_v44 }
  0x50   :  { %518 = vmatpush.msrb.mxu0 %v1308_v7  ;;  %434 = vmatpush.msra.mxu2 %v1565_v53 }
  0x51   :  { %447 = vmatpush.msra.mxu3 %v1546_v50  ;;  %415 = vmatpush.msra.mxu1 %v1526_v47 }
  0x52   :  { %519 = vmatpush.msrb.mxu0 %v1322_v10  ;;  %435 = vmatpush.msra.mxu2 %v1579_v55 }
  0x53   :  { %448 = vmatpush.msra.mxu3 %v1560_v52  ;;  %535 = vmatpush.msrb.mxu1 %v1314_v8 }
  0x54   :  { %520 = vmatpush.msrb.mxu0 %v1340_v14 }
  0x55   :  { %449 = vmatpush.msra.mxu3 %v1573_v54  ;;  %536 = vmatpush.msrb.mxu1 %v1331_v12 }
  0x56   :  { %521 = vmatpush.msrb.mxu0 %v1358_v18 }
  0x57   :  { %450 = vmatpush.msra.mxu3 %v1587_v56  ;;  %537 = vmatpush.msrb.mxu1 %v1349_v16 }
  0x58   :  { %522 = vmatpush.msrb.mxu0 %v1379_v23 }
  0x59   :  { %451 = vmatpush.msra.mxu3 %v1596_v57  ;;  %538 = vmatpush.msrb.mxu1 %v1370_v21 }
  0x5a   :  { %523 = vmatpush.msrb.mxu0 %v1395_v26 }
  0x5b   :  { %452 = vmatpush.msra.mxu3 %v1604_v58  ;;  %539 = vmatpush.msrb.mxu1 %v1385_v24 }
  0x5c   :  { %524 = vmatpush.msrb.mxu0 %v1413_v29 }
  0x5d   :  { %453 = vmatpush.msra.mxu3 %v1613_v59  ;;  %540 = vmatpush.msrb.mxu1 %v1401_v27 }
  0x5e   :  { %525 = vmatpush.msrb.mxu0 %v1431_v32 }
  0x5f   :  { %454 = vmatpush.msra.mxu3 %v1622_v60  ;;  %541 = vmatpush.msrb.mxu1 %v1419_v30 }
  0x60   :  { %526 = vmatpush.msrb.mxu0 %v1450_v35 }
  0x61   :  { %455 = vmatpush.msra.mxu3 %v1631_v61  ;;  %542 = vmatpush.msrb.mxu1 %v1438_v33 }
  0x62   :  { %527 = vmatpush.msrb.mxu0 %v1469_v38 }
  0x63   :  { %543 = vmatpush.msrb.mxu1 %v1457_v36 }
  0x64   :  { %528 = vmatpush.msrb.mxu0 %v1488_v41 }
  0x65   :  { %544 = vmatpush.msrb.mxu1 %v1476_v39 }
  0x66   :  { %529 = vmatpush.msrb.mxu0 %v1507_v44 }
  0x67   :  { %545 = vmatpush.msrb.mxu1 %v1495_v42 }
  0x68   :  { %530 = vmatpush.msrb.mxu0 %v1526_v47 }
  0x69   :  { %546 = vmatpush.msrb.mxu1 %v1514_v45 }
  0x6b   :  { %547 = vmatpush.msrb.mxu1 %v1538_v49 }
  0x6d   :  { %548 = vmatpush.msrb.mxu1 %v1552_v51 }
  0x6f   :  { %549 = vmatpush.msrb.mxu1 %v1565_v53 }
  0x71   :  { %550 = vmatpush.msrb.mxu1 %v1579_v55 }
  0x8a   :  { %v65_v2 = vpop.f32.mrf.mxu0 }
  0x8b   :  { %v66_v4 = vadd.f32 %v65_v2, %v38_v63 }
  0x8c   :  { %v85_v9 = vpop.f32.mrf.mxu1 }
  0x8d   :  { %108 = vst [vmem:[#allocation2] sm:$0xff] %v66_v4  ;;  %v86_v11 = vadd.f32 %v85_v9, %v39_v0 }
  0x8e   :  { %v105_v13 = vpop.f32.mrf.mxu2 }
  0x8f   :  { %109 = vst [vmem:[#allocation2 + $0x8] sm:$0xff] %v86_v11  ;;  %v106_v15 = vadd.f32 %v105_v13, %v40_v6  ;;  %v1240_v13 = vmov 0.0  }
  0x90   :  { %111 = vst [vmem:[%s2268_s6] sm:$0xff] %v1240_v13 }
  0x91   :  { %110 = vst [vmem:[#allocation2 + $0x10] sm:$0xff] %v106_v15 }
  0x98   :  { %v162_v19 = vld [vmem:[#allocation2] ss:$8 sm:$0x7] }
  0x99   :  { %v251_v55 = vrot.slane %v162_v19, 1 }
  0xa5   :  { %v187_v25 = vpop.f32.mrf.mxu3 }
  0xa6   :  { %v188_v62 = vadd.f32 %v187_v25, %v1748_v20  ;;  %v207_v63 = vpop.f32.mrf.mxu0 }
  0xa7   :  { %v208_v0 = vadd.f32 %v207_v63, %v1750_v22 }
  0xa8   :  { %v230_v2 = vadd.f32 %v188_v62, %v162_v19 }
  0xa9   :  { %v253_v4 = vadd.f32 %v251_v55, %v208_v0  ;;  %v1757_v55 = vperm.slane %v160_v17, 2 }
  0xaa   :  { %v1095_v6 = vmul.f32 -1.442695, %v230_v2 }
  0xab   :  { %v1096_v9 = vmul.f32 -1.442695, %v253_v4 }
  0xac   :  { %1112 = vpow2.f32 %v1095_v6 }
  0xad   :  { %1114 = vpow2.f32 %v1096_v9 }
  0xae   :  { %v227_v4 = vpop.f32.mrf.mxu1 }
  0xaf   :  { %v228_v13 = vadd.f32 %v227_v4, %v1757_v55 }
  0xb2   :  { %v1113_v11 = vpop.eup %1112 }
  0xb3   :  { %v1115_v15 = vpop.eup %1114  ;;  %v234_v47 = vadd.f32 1.0, %v1113_v11 }
  0xb4   :  { %v257_v61 = vadd.f32 1.0, %v1115_v15 }
  0xb5   :  { %1116 = vrcp.f32 %v234_v47  ;;  %v246_v6 = vand.u32 2147483648, %v234_v47  ;;  %v244_v22 = vand.u32 2147483647, %v234_v47  ;;  %vm240_vm2 = vweird.f32 %v234_v47 }
  0xb6   :  { %1118 = vrcp.f32 %v257_v61  ;;  %v269_v51 = vand.u32 2147483648, %v257_v61  ;;  %vm263_vm6 = vweird.f32 %v257_v61  ;;  %v267_v41 = vand.u32 2147483647, %v257_v61 }
  0xb7   :  { %v247_v15 = vor.u32 1.1754944e-38, %v246_v6  ;;  %vm245_vm4 = vcmp.eq.f32.partialorder %v244_v22, 8.507059e+37 }
  0xb8   :  { %vm268_vm8 = vcmp.eq.f32.partialorder %v267_v41, 8.507059e+37  ;;  %v2302_v41 = vld [vmem:[#allocation9_spill] sm:$0xff] }
  0xbb   :  { %v1117_v25 = vpop.eup %1116 }
  0xbc   :  { %v1119_v20 = vpop.eup %1118  ;;  %v236_v63 = vmul.f32 %v1117_v25, %v234_v47  ;;  %vm241_vm1 = vweird.f32 %v1117_v25 }
  0xbd   :  { %v259_v62 = vmul.f32 %v1119_v20, %v257_v61  ;;  %vm242_vm3 = vmor %vm240_vm2, %vm241_vm1  ;;  %vm264_vm5 = vweird.f32 %v1119_v20  ;;  %v2309_v61 = vld [vmem:[#allocation5_spill] sm:$0xff] }
  0xbe   :  { %v237_v0 = vsub.f32 1.0, %v236_v63  ;;  %vm265_vm7 = vmor %vm263_vm6, %vm264_vm5 }
  0xbf   :  { %v260_v2 = vsub.f32 1.0, %v259_v62  ;;  %v274_v62 = vrot.slane %v162_v19, 2  ;;  %v2310_v19 = vld [vmem:[#allocation8_spill] sm:$0xff] }
  0xc0   :  { %v238_v9 = vmul.f32 %v1117_v25, %v237_v0 }
  0xc1   :  { %v261_v53 = vmul.f32 %v1119_v20, %v260_v2  ;;  %v270_v2 = vor.u32 1.1754944e-38, %v269_v51  ;;  %v2305_v51 = vld [vmem:[#allocation10_spill] sm:$0xff] }
  0xc2   :  { %v239_v11 = vadd.f32 %v1117_v25, %v238_v9 }
  0xc3   :  { %v262_v17 = vadd.f32 %v1119_v20, %v261_v53  ;;  %v2306_v53 = vld [vmem:[#allocation4_spill] sm:$0xff] }
  0xc4   :  { %v243_v44 = vsel %vm242_vm3, %v1117_v25, %v239_v11 }
  0xc5   :  { %v248_v60 = vsel %vm245_vm4, %v247_v15, %v243_v44  ;;  %v266_v59 = vsel %vm265_vm7, %v1119_v20, %v262_v17  ;;  %v2303_v44 = vld [vmem:[#allocation3_spill] sm:$0xff]  ;;  %v284_v20 = vld [vmem:[#allocation2 + $0x1] ss:$8 sm:$0x7] }
  0xc6   :  { %v273_v63 = vmul.f32 %v248_v60, %v228_v13  ;;  %v271_v4 = vsel %vm268_vm8, %v270_v2, %v266_v59  ;;  %v2307_v59 = vld [vmem:[#allocation7_spill] sm:$0xff]  ;;  %v2311_v15 = vld [vmem:[#allocation12_spill] sm:$0xff] }
  0xc7   :  { %v278_v47 = vsub.f32 1.0, %v271_v4  ;;  %v280_v22 = vmul.f32 %v271_v4, %v1533_v48  ;;  %v2304_v48 = vld [vmem:[#allocation6_spill] sm:$0xff]  ;;  %v2308_v60 = vld [vmem:[#allocation11_spill] sm:$0xff] }
  0xc8   :  { %v276_v0 = vadd.f32 %v274_v62, %v273_v63  ;;  %v2312_v63 = vld [vmem:[#allocation13_spill] sm:$0xff] }
  0xca   :  { %1120 = vtanh.f32 %v276_v0  ;;  %v366_v0 = vrot.slane %v284_v20, 1 }
  0xd0   :  { %v1121_v9 = vpop.eup %1120 }
  0xd1   :  { %v279_v6 = vmul.f32 %v1121_v9, %v278_v47 }
  0xd3   :  { %v1761_v25 = vadd.f32 %v280_v22, %v279_v6 }
  0xd5   :  { %282 = vst [vmem:[%s2268_s6] sm:$0x1] %v1761_v25  ;;  %301 = vmatmul.f32.vlgmr.msrb.gmra.mxu2 %v1761_v25  ;;  %321 = vmatmul.f32.vlgmr.msrb.gmra.mxu3 %v1761_v25 }
  0xd6   :  { %341 = vmatmul.f32.vlgmr.msra.gmra.mxu0 %v1761_v25  ;;  %555 = vmatpush.msrb.mxu2 %v1407_v28 }
  0xd7   :  { %630 = vmatpush.msrb.mxu3 %v1282_v1  ;;  %650 = vmatpush.msra.mxu0 %v1314_v8 }
  0xd8   :  { %556 = vmatpush.msrb.mxu2 %v1425_v31 }
  0xd9   :  { %631 = vmatpush.msrb.mxu3 %v1291_v3  ;;  %651 = vmatpush.msra.mxu0 %v1331_v12 }
  0xda   :  { %557 = vmatpush.msrb.mxu2 %v1443_v34 }
  0xdb   :  { %632 = vmatpush.msrb.mxu3 %v1299_v5  ;;  %652 = vmatpush.msra.mxu0 %v1349_v16 }
  0xdc   :  { %558 = vmatpush.msrb.mxu2 %v1462_v37 }
  0xdd   :  { %633 = vmatpush.msrb.mxu3 %v1308_v7  ;;  %653 = vmatpush.msra.mxu0 %v1370_v21 }
  0xde   :  { %559 = vmatpush.msrb.mxu2 %v1481_v40 }
  0xdf   :  { %634 = vmatpush.msrb.mxu3 %v1322_v10  ;;  %654 = vmatpush.msra.mxu0 %v1385_v24 }
  0xe0   :  { %560 = vmatpush.msrb.mxu2 %v1500_v43 }
  0xe1   :  { %635 = vmatpush.msrb.mxu3 %v1340_v14  ;;  %655 = vmatpush.msra.mxu0 %v1401_v27 }
  0xe2   :  { %561 = vmatpush.msrb.mxu2 %v1519_v46 }
  0xe3   :  { %636 = vmatpush.msrb.mxu3 %v1358_v18  ;;  %656 = vmatpush.msra.mxu0 %v1419_v30 }
  0xe4   :  { %562 = vmatpush.msrb.mxu2 %v1546_v50 }
  0xe5   :  { %637 = vmatpush.msrb.mxu3 %v1379_v23  ;;  %657 = vmatpush.msra.mxu0 %v1438_v33 }
  0xe6   :  { %563 = vmatpush.msrb.mxu2 %v1560_v52 }
  0xe7   :  { %638 = vmatpush.msrb.mxu3 %v1395_v26  ;;  %658 = vmatpush.msra.mxu0 %v1457_v36 }
  0xe8   :  { %564 = vmatpush.msrb.mxu2 %v1573_v54 }
  0xe9   :  { %639 = vmatpush.msrb.mxu3 %v1413_v29  ;;  %659 = vmatpush.msra.mxu0 %v1476_v39 }
  0xea   :  { %565 = vmatpush.msrb.mxu2 %v1587_v56 }
  0xeb   :  { %640 = vmatpush.msrb.mxu3 %v1431_v32  ;;  %660 = vmatpush.msra.mxu0 %v1495_v42 }
  0xec   :  { %566 = vmatpush.msrb.mxu2 %v1596_v57 }
  0xed   :  { %641 = vmatpush.msrb.mxu3 %v1450_v35  ;;  %661 = vmatpush.msra.mxu0 %v1514_v45 }
  0xee   :  { %567 = vmatpush.msrb.mxu2 %v1604_v58 }
  0xef   :  { %642 = vmatpush.msrb.mxu3 %v1469_v38  ;;  %662 = vmatpush.msra.mxu0 %v1538_v49 }
  0xf0   :  { %568 = vmatpush.msrb.mxu2 %v2302_v41 }
  0xf1   :  { %643 = vmatpush.msrb.mxu3 %v2303_v44  ;;  %663 = vmatpush.msra.mxu0 %v2304_v48 }
  0xf2   :  { %569 = vmatpush.msrb.mxu2 %v2305_v51 }
  0xf3   :  { %644 = vmatpush.msrb.mxu3 %v2306_v53  ;;  %664 = vmatpush.msra.mxu0 %v2307_v59 }
  0xf4   :  { %570 = vmatpush.msrb.mxu2 %v2308_v60 }
  0xf5   :  { %645 = vmatpush.msrb.mxu3 %v2309_v61  ;;  %665 = vmatpush.msra.mxu0 %v2310_v19 }
 0x158   :  { %v302_v13 = vpop.f32.mrf.mxu2  ;;  %v322_v11 = vpop.f32.mrf.mxu3 }
 0x159   :  { %v303_v17 = vadd.f32 %v302_v13, %v2311_v15  ;;  %v323_v62 = vadd.f32 %v322_v11, %v2312_v63 }
 0x15b   :  { %v345_v2 = vadd.f32 %v303_v17, %v284_v20  ;;  %v368_v4 = vadd.f32 %v366_v0, %v323_v62  ;;  %v342_v62 = vpop.f32.mrf.mxu0 }
 0x15d   :  { %v1097_v47 = vmul.f32 -1.442695, %v345_v2  ;;  %v1098_v9 = vmul.f32 -1.442695, %v368_v4 }
 0x15f   :  { %1122 = vpow2.f32 %v1097_v47  ;;  %v343_v47 = vadd.f32 %v342_v62, %v1757_v55 }
 0x160   :  { %1124 = vpow2.f32 %v1098_v9 }
 0x165   :  { %v1123_v6 = vpop.eup %1122 }
 0x166   :  { %v1125_v22 = vpop.eup %1124  ;;  %v349_v60 = vadd.f32 1.0, %v1123_v6 }
 0x167   :  { %v372_v61 = vadd.f32 1.0, %v1125_v22 }
 0x168   :  { %1126 = vrcp.f32 %v349_v60  ;;  %v361_v15 = vand.u32 2147483648, %v349_v60  ;;  %v359_v17 = vand.u32 2147483647, %v349_v60  ;;  %vm355_vm10 = vweird.f32 %v349_v60 }
 0x169   :  { %1128 = vrcp.f32 %v372_v61  ;;  %v384_v44 = vand.u32 2147483648, %v372_v61  ;;  %vm378_vm14 = vweird.f32 %v372_v61 }
 0x16a   :  { %v362_v4 = vor.u32 1.1754944e-38, %v361_v15  ;;  %vm360_vm12 = vcmp.eq.f32.partialorder %v359_v17, 8.507059e+37 }
 0x16e   :  { %v1127_v19 = vpop.eup %1126 }
 0x16f   :  { %v1129_v59 = vpop.eup %1128  ;;  %v351_v53 = vmul.f32 %v1127_v19, %v349_v60  ;;  %vm356_vm9 = vweird.f32 %v1127_v19 }
 0x170   :  { %v374_v51 = vmul.f32 %v1129_v59, %v372_v61  ;;  %vm357_vm11 = vmor %vm355_vm10, %vm356_vm9  ;;  %vm379_vm13 = vweird.f32 %v1129_v59 }
 0x171   :  { %v352_v13 = vsub.f32 1.0, %v351_v53  ;;  %v389_v53 = vrot.slane %v284_v20, 2  ;;  %vm380_vm15 = vmor %vm378_vm14, %vm379_vm13 }
 0x172   :  { %v375_v11 = vsub.f32 1.0, %v374_v51  ;;  %v382_v51 = vand.u32 2147483647, %v372_v61 }
 0x173   :  { %v353_v63 = vmul.f32 %v1127_v19, %v352_v13 }
 0x174   :  { %v376_v0 = vmul.f32 %v1129_v59, %v375_v11  ;;  %vm383_vm0 = vcmp.eq.f32.partialorder %v382_v51, 8.507059e+37 }
 0x175   :  { %v354_v2 = vadd.f32 %v1127_v19, %v353_v63  ;;  %v385_v63 = vor.u32 1.1754944e-38, %v384_v44 }
 0x176   :  { %v377_v22 = vadd.f32 %v1129_v59, %v376_v0 }
 0x177   :  { %v358_v9 = vsel %vm357_vm11, %v1127_v19, %v354_v2 }
 0x178   :  { %v363_v6 = vsel %vm360_vm12, %v362_v4, %v358_v9  ;;  %v381_v41 = vsel %vm380_vm15, %v1129_v59, %v377_v22 }
 0x179   :  { %v388_v48 = vmul.f32 %v363_v6, %v343_v47  ;;  %v386_v60 = vsel %vm383_vm0, %v385_v63, %v381_v41 }
 0x17a   :  { %v393_v15 = vsub.f32 1.0, %v386_v60  ;;  %v395_v19 = vmul.f32 %v386_v60, %v1761_v25 }
 0x17b   :  { %v391_v13 = vadd.f32 %v389_v53, %v388_v48 }
 0x17d   :  { %1130 = vtanh.f32 %v391_v13 }
 0x183   :  { %v1131_v11 = vpop.eup %1130 }
 0x184   :  { %v394_v62 = vmul.f32 %v1131_v11, %v393_v15 }
 0x186   :  { %v1822_v17 = vadd.f32 %v395_v19, %v394_v62 }
 0x188   :  { %397 = vst [vmem:[%s2268_s6 + $0x1] sm:$0x1] %v1822_v17  ;;  %416 = vmatmul.f32.vlgmr.msra.gmra.mxu1 %v1822_v17  ;;  %436 = vmatmul.f32.vlgmr.msra.gmra.mxu2 %v1822_v17 }
 0x189   :  { %456 = vmatmul.f32.vlgmr.msra.gmra.mxu3 %v1822_v17  ;;  %670 = vmatpush.msra.mxu1 %v1407_v28 }
 0x18a   :  { %745 = vmatpush.msra.mxu2 %v1282_v1  ;;  %765 = vmatpush.msra.mxu3 %v1314_v8  ;;  %v2313_v1 = vld [vmem:[#allocation9_spill] sm:$0xff]  ;;  %v2317_v8 = vld [vmem:[#allocation4_spill] sm:$0xff] }
 0x18b   :  { %671 = vmatpush.msra.mxu1 %v1425_v31 }
 0x18c   :  { %746 = vmatpush.msra.mxu2 %v1291_v3  ;;  %766 = vmatpush.msra.mxu3 %v1331_v12  ;;  %v2314_v3 = vld [vmem:[#allocation3_spill] sm:$0xff] }
 0x18d   :  { %672 = vmatpush.msra.mxu1 %v1443_v34  ;;  %v2319_v12 = vld [vmem:[#allocation11_spill] sm:$0xff] }
 0x18e   :  { %747 = vmatpush.msra.mxu2 %v1299_v5  ;;  %767 = vmatpush.msra.mxu3 %v1349_v16  ;;  %v2315_v5 = vld [vmem:[#allocation6_spill] sm:$0xff]  ;;  %v2321_v16 = vld [vmem:[#allocation8_spill] sm:$0xff] }
 0x18f   :  { %673 = vmatpush.msra.mxu1 %v1462_v37 }
 0x190   :  { %748 = vmatpush.msra.mxu2 %v1308_v7  ;;  %768 = vmatpush.msra.mxu3 %v1370_v21  ;;  %v2316_v7 = vld [vmem:[#allocation10_spill] sm:$0xff]  ;;  %v2322_v21 = vld [vmem:[#allocation12_spill] sm:$0xff] }
 0x191   :  { %674 = vmatpush.msra.mxu1 %v1481_v40 }
 0x192   :  { %749 = vmatpush.msra.mxu2 %v1322_v10  ;;  %769 = vmatpush.msra.mxu3 %v1385_v24  ;;  %v2318_v10 = vld [vmem:[#allocation7_spill] sm:$0xff]  ;;  %v399_v24 = vld [vmem:[#allocation2 + $0x2] ss:$8 sm:$0x7] }
 0x193   :  { %675 = vmatpush.msra.mxu1 %v1500_v43  ;;  %v504_v60 = vrot.slane %v399_v24, 2 }
 0x194   :  { %750 = vmatpush.msra.mxu2 %v1340_v14  ;;  %770 = vmatpush.msra.mxu3 %v1401_v27  ;;  %v2320_v14 = vld [vmem:[#allocation5_spill] sm:$0xff] }
 0x195   :  { %676 = vmatpush.msra.mxu1 %v1519_v46 }
 0x196   :  { %751 = vmatpush.msra.mxu2 %v1358_v18  ;;  %771 = vmatpush.msra.mxu3 %v1419_v30  ;;  %v2323_v30 = vld [vmem:[#allocation13_spill] sm:$0xff] }
 0x197   :  { %677 = vmatpush.msra.mxu1 %v1546_v50 }
 0x198   :  { %752 = vmatpush.msra.mxu2 %v1379_v23  ;;  %772 = vmatpush.msra.mxu3 %v1438_v33  ;;  %v481_v33 = vrot.slane %v399_v24, 1 }
 0x199   :  { %678 = vmatpush.msra.mxu1 %v1560_v52 }
 0x19a   :  { %753 = vmatpush.msra.mxu2 %v1395_v26  ;;  %773 = vmatpush.msra.mxu3 %v1457_v36 }
 0x19b   :  { %679 = vmatpush.msra.mxu1 %v1573_v54 }
 0x19c   :  { %754 = vmatpush.msra.mxu2 %v1413_v29  ;;  %774 = vmatpush.msra.mxu3 %v1476_v39 }
 0x19d   :  { %680 = vmatpush.msra.mxu1 %v1587_v56 }
 0x19e   :  { %755 = vmatpush.msra.mxu2 %v1431_v32  ;;  %775 = vmatpush.msra.mxu3 %v1495_v42 }
 0x19f   :  { %681 = vmatpush.msra.mxu1 %v1596_v57 }
 0x1a0   :  { %756 = vmatpush.msra.mxu2 %v1450_v35  ;;  %776 = vmatpush.msra.mxu3 %v1514_v45 }
 0x1a1   :  { %682 = vmatpush.msra.mxu1 %v1604_v58 }
 0x1a2   :  { %757 = vmatpush.msra.mxu2 %v1469_v38  ;;  %777 = vmatpush.msra.mxu3 %v1538_v49 }
 0x1a3   :  { %683 = vmatpush.msra.mxu1 %v2313_v1 }
 0x1a4   :  { %758 = vmatpush.msra.mxu2 %v2314_v3  ;;  %778 = vmatpush.msra.mxu3 %v2315_v5 }
 0x1a5   :  { %684 = vmatpush.msra.mxu1 %v2316_v7 }
 0x1a6   :  { %759 = vmatpush.msra.mxu2 %v2317_v8  ;;  %779 = vmatpush.msra.mxu3 %v2318_v10 }
 0x1a7   :  { %685 = vmatpush.msra.mxu1 %v2319_v12 }
 0x1a8   :  { %760 = vmatpush.msra.mxu2 %v2320_v14  ;;  %780 = vmatpush.msra.mxu3 %v2321_v16 }
 0x205   :  { %v417_v18 = vpop.f32.mrf.mxu1 }
 0x206   :  { %v418_v23 = vadd.f32 %v417_v18, %v2322_v21 }
 0x208   :  { %v460_v26 = vadd.f32 %v418_v23, %v399_v24 }
 0x20a   :  { %v1099_v27 = vmul.f32 -1.442695, %v460_v26 }
 0x20b   :  { %v437_v29 = vpop.f32.mrf.mxu2 }
 0x20c   :  { %1132 = vpow2.f32 %v1099_v27  ;;  %v438_v32 = vadd.f32 %v437_v29, %v2323_v30  ;;  %v457_v47 = vpop.f32.mrf.mxu3 }
 0x20d   :  { %v458_v51 = vadd.f32 %v457_v47, %v1757_v55 }
 0x20e   :  { %v483_v35 = vadd.f32 %v481_v33, %v438_v32 }
 0x210   :  { %v1100_v36 = vmul.f32 -1.442695, %v483_v35 }
 0x212   :  { %v1133_v38 = vpop.eup %1132  ;;  %1134 = vpow2.f32 %v1100_v36  ;;  %v1896_v36 = vld [vmem:[%s2263_s2 + $0x168] sm:$0xff] }
 0x213   :  { %v464_v25 = vadd.f32 1.0, %v1133_v38  ;;  %v1915_v38 = vld [vmem:[%s2263_s2 + $0x158] sm:$0xff] }
 0x215   :  { %1136 = vrcp.f32 %v464_v25  ;;  %v476_v20 = vand.u32 2147483648, %v464_v25  ;;  %v474_v2 = vand.u32 2147483647, %v464_v25  ;;  %vm470_vm2 = vweird.f32 %v464_v25 }
 0x217   :  { %v477_v22 = vor.u32 1.1754944e-38, %v476_v20  ;;  %vm475_vm4 = vcmp.eq.f32.partialorder %v474_v2, 8.507059e+37  ;;  %v2006_v20 = vld [vmem:[%s2263_s2 + $0xb0] sm:$0xff] }
 0x218   :  { %v1135_v41 = vpop.eup %1134 }
 0x219   :  { %v487_v44 = vadd.f32 1.0, %v1135_v41  ;;  %v1941_v41 = vld [vmem:[%s2263_s2 + $0x128] sm:$0xff] }
 0x21b   :  { %v1137_v48 = vpop.eup %1136  ;;  %1138 = vrcp.f32 %v487_v44  ;;  %v499_v11 = vand.u32 2147483648, %v487_v44  ;;  %v497_v19 = vand.u32 2147483647, %v487_v44  ;;  %vm493_vm6 = vweird.f32 %v487_v44 }
 0x21c   :  { %v466_v59 = vmul.f32 %v1137_v48, %v464_v25  ;;  %vm471_vm1 = vweird.f32 %v1137_v48  ;;  %v1928_v25 = vld [vmem:[%s2263_s2 + $0x140] sm:$0xff] }
 0x21d   :  { %vm472_vm3 = vmor %vm470_vm2, %vm471_vm1  ;;  %v500_v23 = vor.u32 1.1754944e-38, %v499_v11  ;;  %vm498_vm8 = vcmp.eq.f32.partialorder %v497_v19, 8.507059e+37 }
 0x21e   :  { %v467_v61 = vsub.f32 1.0, %v466_v59  ;;  %v1980_v59 = vld [vmem:[%s2263_s2 + $0xe0] sm:$0xff] }
 0x220   :  { %v468_v0 = vmul.f32 %v1137_v48, %v467_v61  ;;  %v1993_v61 = vld [vmem:[%s2263_s2 + $0xc8] sm:$0xff] }
 0x221   :  { %v1139_v4 = vpop.eup %1138 }
 0x222   :  { %v489_v9 = vmul.f32 %v1139_v4, %v487_v44  ;;  %v469_v6 = vadd.f32 %v1137_v48, %v468_v0  ;;  %vm494_vm5 = vweird.f32 %v1139_v4  ;;  %v1954_v44 = vld [vmem:[%s2263_s2 + $0x110] sm:$0xff]  ;;  %v2021_v0 = vld [vmem:[%s2263_s2 + $0x78] sm:$0xff] }
 0x223   :  { %vm495_vm7 = vmor %vm493_vm6, %vm494_vm5 }
 0x224   :  { %v490_v53 = vsub.f32 1.0, %v489_v9  ;;  %v473_v13 = vsel %vm472_vm3, %v1137_v48, %v469_v6  ;;  %v1967_v48 = vld [vmem:[%s2263_s2 + $0xf8] sm:$0xff] }
 0x225   :  { %v478_v63 = vsel %vm475_vm4, %v477_v22, %v473_v13 }
 0x226   :  { %v491_v15 = vmul.f32 %v1139_v4, %v490_v53  ;;  %v503_v62 = vmul.f32 %v478_v63, %v458_v51 }
 0x228   :  { %v492_v3 = vadd.f32 %v1139_v4, %v491_v15  ;;  %v506_v18 = vadd.f32 %v504_v60, %v503_v62 }
 0x22a   :  { %v496_v26 = vsel %vm495_vm7, %v1139_v4, %v492_v3  ;;  %1140 = vtanh.f32 %v506_v18 }
 0x22b   :  { %v501_v27 = vsel %vm498_vm8, %v500_v23, %v496_v26 }
 0x22c   :  { %v508_v29 = vsub.f32 1.0, %v501_v27  ;;  %v510_v35 = vmul.f32 %v501_v27, %v1822_v17  ;;  %v1902_v17 = vld [vmem:[%s2263_s2 + $0x170] sm:$0xff] }
 0x230   :  { %v1141_v32 = vpop.eup %1140 }
 0x231   :  { %v509_v33 = vmul.f32 %v1141_v32, %v508_v29 }
 0x233   :  { %v1883_v24 = vadd.f32 %v510_v35, %v509_v33 }
 0x235   :  { %512 = vst [vmem:[%s2268_s6 + $0x2] sm:$0x1] %v1883_v24  ;;  %531 = vmatmul.f32.vlgmr.msrb.gmra.mxu0 %v1883_v24  ;;  %551 = vmatmul.f32.vlgmr.msrb.gmra.mxu1 %v1883_v24 }
 0x236   :  { %571 = vmatmul.f32.vlgmr.msrb.gmra.mxu2 %v1883_v24  ;;  %785 = vmatpush.msrb.mxu0 %v1407_v28  ;;  %v1909_v28 = vld [vmem:[%s2263_s2 + $0x150] sm:$0xff] }
 0x237   :  { %860 = vmatpush.msrb.mxu1 %v1896_v36  ;;  %880 = vmatpush.msrb.mxu2 %v1902_v17 }
 0x238   :  { %786 = vmatpush.msrb.mxu0 %v1425_v31  ;;  %v1922_v31 = vld [vmem:[%s2263_s2 + $0x138] sm:$0xff] }
 0x239   :  { %861 = vmatpush.msrb.mxu1 %v1909_v28  ;;  %881 = vmatpush.msrb.mxu2 %v1915_v38 }
 0x23a   :  { %787 = vmatpush.msrb.mxu0 %v1443_v34  ;;  %v1935_v34 = vld [vmem:[%s2263_s2 + $0x120] sm:$0xff] }
 0x23b   :  { %862 = vmatpush.msrb.mxu1 %v1922_v31  ;;  %882 = vmatpush.msrb.mxu2 %v1928_v25 }
 0x23c   :  { %788 = vmatpush.msrb.mxu0 %v1462_v37  ;;  %v1948_v37 = vld [vmem:[%s2263_s2 + $0x108] sm:$0xff] }
 0x23d   :  { %863 = vmatpush.msrb.mxu1 %v1935_v34  ;;  %883 = vmatpush.msrb.mxu2 %v1941_v41 }
 0x23e   :  { %789 = vmatpush.msrb.mxu0 %v1481_v40  ;;  %v1961_v40 = vld [vmem:[%s2263_s2 + $0xf0] sm:$0xff] }
 0x23f   :  { %864 = vmatpush.msrb.mxu1 %v1948_v37  ;;  %884 = vmatpush.msrb.mxu2 %v1954_v44 }
 0x240   :  { %790 = vmatpush.msrb.mxu0 %v1500_v43  ;;  %v1974_v43 = vld [vmem:[%s2263_s2 + $0xd8] sm:$0xff] }
 0x241   :  { %865 = vmatpush.msrb.mxu1 %v1961_v40  ;;  %885 = vmatpush.msrb.mxu2 %v1967_v48 }
 0x242   :  { %791 = vmatpush.msrb.mxu0 %v1519_v46  ;;  %v1987_v46 = vld [vmem:[%s2263_s2 + $0xc0] sm:$0xff] }
 0x243   :  { %866 = vmatpush.msrb.mxu1 %v1974_v43  ;;  %886 = vmatpush.msrb.mxu2 %v1980_v59 }
 0x244   :  { %792 = vmatpush.msrb.mxu0 %v1546_v50  ;;  %v2000_v50 = vld [vmem:[%s2263_s2 + $0xa8] sm:$0xff] }
 0x245   :  { %867 = vmatpush.msrb.mxu1 %v1987_v46  ;;  %887 = vmatpush.msrb.mxu2 %v1993_v61 }
 0x246   :  { %793 = vmatpush.msrb.mxu0 %v1560_v52  ;;  %v2013_v52 = vld [vmem:[%s2263_s2 + $0x90] sm:$0xff] }
 0x247   :  { %868 = vmatpush.msrb.mxu1 %v2000_v50  ;;  %888 = vmatpush.msrb.mxu2 %v2006_v20 }
 0x248   :  { %794 = vmatpush.msrb.mxu0 %v1573_v54  ;;  %v2029_v54 = vld [vmem:[%s2263_s2 + $0x60] sm:$0xff] }
 0x249   :  { %869 = vmatpush.msrb.mxu1 %v2013_v52  ;;  %889 = vmatpush.msrb.mxu2 %v1476_v39  ;;  %v2037_v39 = vld [vmem:[%s2263_s2 + $0x48] sm:$0xff] }
 0x24a   :  { %795 = vmatpush.msrb.mxu0 %v1587_v56 }
 0x24b   :  { %870 = vmatpush.msrb.mxu1 %v2021_v0  ;;  %890 = vmatpush.msrb.mxu2 %v1495_v42  ;;  %v2045_v42 = vld [vmem:[%s2263_s2 + $0x30] sm:$0xff] }
 0x24c   :  { %796 = vmatpush.msrb.mxu0 %v1596_v57 }
 0x24d   :  { %871 = vmatpush.msrb.mxu1 %v2029_v54  ;;  %891 = vmatpush.msrb.mxu2 %v1514_v45  ;;  %v514_v45 = vld [vmem:[#allocation2 + $0x3] ss:$8 sm:$0x7] }
 0x24e   :  { %797 = vmatpush.msrb.mxu0 %v1604_v58  ;;  %v619_v29 = vrot.slane %v514_v45, 2 }
 0x24f   :  { %872 = vmatpush.msrb.mxu1 %v2037_v39  ;;  %892 = vmatpush.msrb.mxu2 %v1538_v49 }
 0x250   :  { %798 = vmatpush.msrb.mxu0 %v2313_v1  ;;  %v596_v1 = vrot.slane %v514_v45, 1 }
 0x251   :  { %873 = vmatpush.msrb.mxu1 %v2045_v42  ;;  %893 = vmatpush.msrb.mxu2 %v2315_v5 }
 0x252   :  { %799 = vmatpush.msrb.mxu0 %v2316_v7 }
 0x253   :  { %874 = vmatpush.msrb.mxu1 %v2317_v8  ;;  %894 = vmatpush.msrb.mxu2 %v2318_v10 }
 0x254   :  { %800 = vmatpush.msrb.mxu0 %v2319_v12 }
 0x255   :  { %875 = vmatpush.msrb.mxu1 %v2320_v14  ;;  %895 = vmatpush.msrb.mxu2 %v2321_v16 }
 0x2b2   :  { %v532_v49 = vpop.f32.mrf.mxu0  ;;  %v552_v56 = vpop.f32.mrf.mxu1 }
 0x2b3   :  { %v533_v57 = vadd.f32 %v532_v49, %v2322_v21  ;;  %v553_v58 = vadd.f32 %v552_v56, %v2323_v30 }
 0x2b5   :  { %v575_v5 = vadd.f32 %v533_v57, %v514_v45  ;;  %v598_v7 = vadd.f32 %v596_v1, %v553_v58  ;;  %v2071_v45 = vld [vmem:[%s2263_s2 + $0x178] sm:$0xff] }
 0x2b7   :  { %v1101_v2 = vmul.f32 -1.442695, %v575_v5  ;;  %v1102_v8 = vmul.f32 -1.442695, %v598_v7 }
 0x2b9   :  { %1142 = vpow2.f32 %v1101_v2  ;;  %v572_v15 = vpop.f32.mrf.mxu2  ;;  %v2087_v2 = vld [vmem:[%s2263_s2 + $0x148] sm:$0xff] }
 0x2ba   :  { %1144 = vpow2.f32 %v1102_v8  ;;  %v573_v19 = vadd.f32 %v572_v15, %v1757_v55 }
 0x2bf   :  { %v1143_v10 = vpop.eup %1142 }
 0x2c0   :  { %v1145_v12 = vpop.eup %1144  ;;  %v579_v4 = vadd.f32 1.0, %v1143_v10 }
 0x2c1   :  { %v602_v14 = vadd.f32 1.0, %v1145_v12 }
 0x2c2   :  { %1146 = vrcp.f32 %v579_v4  ;;  %v591_v51 = vand.u32 2147483648, %v579_v4  ;;  %v589_v63 = vand.u32 2147483647, %v579_v4  ;;  %vm585_vm10 = vweird.f32 %v579_v4 }
 0x2c3   :  { %1148 = vrcp.f32 %v602_v14  ;;  %v614_v26 = vand.u32 2147483648, %v602_v14  ;;  %vm608_vm14 = vweird.f32 %v602_v14  ;;  %v612_v32 = vand.u32 2147483647, %v602_v14 }
 0x2c4   :  { %v592_v62 = vor.u32 1.1754944e-38, %v591_v51  ;;  %vm590_vm12 = vcmp.eq.f32.partialorder %v589_v63, 8.507059e+37 }
 0x2c5   :  { %v615_v49 = vor.u32 1.1754944e-38, %v614_v26  ;;  %vm613_vm0 = vcmp.eq.f32.partialorder %v612_v32, 8.507059e+37 }
 0x2c8   :  { %v1147_v16 = vpop.eup %1146 }
 0x2c9   :  { %v1149_v47 = vpop.eup %1148  ;;  %v581_v9 = vmul.f32 %v1147_v16, %v579_v4  ;;  %vm586_vm9 = vweird.f32 %v1147_v16 }
 0x2ca   :  { %v604_v6 = vmul.f32 %v1149_v47, %v602_v14  ;;  %vm587_vm11 = vmor %vm585_vm10, %vm586_vm9  ;;  %vm609_vm13 = vweird.f32 %v1149_v47 }
 0x2cb   :  { %v582_v22 = vsub.f32 1.0, %v581_v9  ;;  %vm610_vm15 = vmor %vm608_vm14, %vm609_vm13 }
 0x2cc   :  { %v605_v53 = vsub.f32 1.0, %v604_v6 }
 0x2cd   :  { %v583_v13 = vmul.f32 %v1147_v16, %v582_v22 }
 0x2ce   :  { %v606_v60 = vmul.f32 %v1149_v47, %v605_v53 }
 0x2cf   :  { %v584_v11 = vadd.f32 %v1147_v16, %v583_v13 }
 0x2d0   :  { %v607_v23 = vadd.f32 %v1149_v47, %v606_v60 }
 0x2d1   :  { %v588_v3 = vsel %vm587_vm11, %v1147_v16, %v584_v11 }
 0x2d2   :  { %v593_v18 = vsel %vm590_vm12, %v592_v62, %v588_v3  ;;  %v611_v35 = vsel %vm610_vm15, %v1149_v47, %v607_v23 }
 0x2d3   :  { %v618_v27 = vmul.f32 %v593_v18, %v573_v19  ;;  %v616_v56 = vsel %vm613_vm0, %v615_v49, %v611_v35 }
 0x2d4   :  { %v623_v57 = vsub.f32 1.0, %v616_v56  ;;  %v625_v5 = vmul.f32 %v616_v56, %v1883_v24  ;;  %v2079_v24 = vld [vmem:[%s2263_s2 + $0x160] sm:$0xff] }
 0x2d5   :  { %v621_v33 = vadd.f32 %v619_v29, %v618_v27 }
 0x2d7   :  { %1150 = vtanh.f32 %v621_v33 }
 0x2dd   :  { %v1151_v58 = vpop.eup %1150 }
 0x2de   :  { %v624_v1 = vmul.f32 %v1151_v58, %v623_v57 }
 0x2e0   :  { %v2059_v7 = vadd.f32 %v625_v5, %v624_v1 }
 0x2e2   :  { %627 = vst [vmem:[%s2268_s6 + $0x3] sm:$0x1] %v2059_v7  ;;  %646 = vmatmul.f32.vlgmr.msrb.gmra.mxu3 %v2059_v7  ;;  %666 = vmatmul.f32.vlgmr.msra.gmra.mxu0 %v2059_v7 }
 0x2e3   :  { %686 = vmatmul.f32.vlgmr.msra.gmra.mxu1 %v2059_v7  ;;  %900 = vmatpush.msrb.mxu3 %v2071_v45 }
 0x2e4   :  { %975 = vmatpush.msra.mxu0 %v1896_v36  ;;  %995 = vmatpush.msra.mxu1 %v1902_v17  ;;  %v2095_v36 = vld [vmem:[%s2263_s2 + $0x130] sm:$0xff]  ;;  %v2103_v17 = vld [vmem:[%s2263_s2 + $0x118] sm:$0xff] }
 0x2e5   :  { %901 = vmatpush.msrb.mxu3 %v2079_v24 }
 0x2e6   :  { %976 = vmatpush.msra.mxu0 %v1909_v28  ;;  %996 = vmatpush.msra.mxu1 %v1915_v38  ;;  %v2111_v28 = vld [vmem:[%s2263_s2 + $0x100] sm:$0xff]  ;;  %v2119_v38 = vld [vmem:[%s2263_s2 + $0xe8] sm:$0xff] }
 0x2e7   :  { %902 = vmatpush.msrb.mxu3 %v2087_v2 }
 0x2e8   :  { %977 = vmatpush.msra.mxu0 %v1922_v31  ;;  %997 = vmatpush.msra.mxu1 %v1928_v25  ;;  %v2127_v31 = vld [vmem:[%s2263_s2 + $0xd0] sm:$0xff]  ;;  %v2135_v25 = vld [vmem:[%s2263_s2 + $0xb8] sm:$0xff] }
 0x2e9   :  { %903 = vmatpush.msrb.mxu3 %v2095_v36 }
 0x2ea   :  { %978 = vmatpush.msra.mxu0 %v1935_v34  ;;  %998 = vmatpush.msra.mxu1 %v1941_v41  ;;  %v2143_v34 = vld [vmem:[%s2263_s2 + $0xa0] sm:$0xff]  ;;  %v1225_v41 = vld [vmem:[%s2263_s2 + $0x98] sm:$0xff] }
 0x2eb   :  { %904 = vmatpush.msrb.mxu3 %v2103_v17 }
 0x2ec   :  { %979 = vmatpush.msra.mxu0 %v1948_v37  ;;  %999 = vmatpush.msra.mxu1 %v1954_v44  ;;  %v2153_v37 = vld [vmem:[%s2263_s2 + $0x88] sm:$0xff]  ;;  %v1227_v44 = vld [vmem:[%s2263_s2 + $0x80] sm:$0xff] }
 0x2ed   :  { %905 = vmatpush.msrb.mxu3 %v2111_v28 }
 0x2ee   :  { %980 = vmatpush.msra.mxu0 %v1961_v40  ;;  %1000 = vmatpush.msra.mxu1 %v1967_v48  ;;  %v2163_v40 = vld [vmem:[%s2263_s2 + $0x70] sm:$0xff]  ;;  %v1229_v48 = vld [vmem:[%s2263_s2 + $0x68] sm:$0xff] }
 0x2ef   :  { %906 = vmatpush.msrb.mxu3 %v2119_v38 }
 0x2f0   :  { %981 = vmatpush.msra.mxu0 %v1974_v43  ;;  %1001 = vmatpush.msra.mxu1 %v1980_v59  ;;  %v2173_v43 = vld [vmem:[%s2263_s2 + $0x58] sm:$0xff]  ;;  %v1231_v59 = vld [vmem:[%s2263_s2 + $0x50] sm:$0xff] }
 0x2f1   :  { %907 = vmatpush.msrb.mxu3 %v2127_v31 }
 0x2f2   :  { %982 = vmatpush.msra.mxu0 %v1987_v46  ;;  %1002 = vmatpush.msra.mxu1 %v1993_v61  ;;  %v2183_v46 = vld [vmem:[%s2263_s2 + $0x40] sm:$0xff]  ;;  %v1233_v61 = vld [vmem:[%s2263_s2 + $0x38] sm:$0xff] }
 0x2f3   :  { %908 = vmatpush.msrb.mxu3 %v2135_v25 }
 0x2f4   :  { %983 = vmatpush.msra.mxu0 %v2000_v50  ;;  %1003 = vmatpush.msra.mxu1 %v2006_v20  ;;  %v2193_v50 = vld [vmem:[%s2263_s2 + $0x28] sm:$0xff]  ;;  %v1235_v20 = vld [vmem:[%s2263_s2 + $0x18] sm:$0xff] }
 0x2f5   :  { %909 = vmatpush.msrb.mxu3 %v2143_v34 }
 0x2f6   :  { %984 = vmatpush.msra.mxu0 %v2013_v52  ;;  %1004 = vmatpush.msra.mxu1 %v1225_v41  ;;  %v1236_v52 = vld [vmem:[%s2263_s2 + $0x20] sm:$0xff] }
 0x2f7   :  { %910 = vmatpush.msrb.mxu3 %v2153_v37 }
 0x2f8   :  { %985 = vmatpush.msra.mxu0 %v2021_v0  ;;  %1005 = vmatpush.msra.mxu1 %v1227_v44  ;;  %v2205_v0 = vld [vmem:[%s2263_s2 + $0x10] sm:$0xff] }
 0x2f9   :  { %911 = vmatpush.msrb.mxu3 %v2163_v40 }
 0x2fa   :  { %986 = vmatpush.msra.mxu0 %v2029_v54  ;;  %1006 = vmatpush.msra.mxu1 %v1229_v48  ;;  %v1238_v54 = vld [vmem:[%s2263_s2] sm:$0xff] }
 0x2fb   :  { %912 = vmatpush.msrb.mxu3 %v2173_v43 }
 0x2fc   :  { %987 = vmatpush.msra.mxu0 %v2037_v39  ;;  %1007 = vmatpush.msra.mxu1 %v1231_v59  ;;  %v1239_v39 = vld [vmem:[%s2263_s2 + $0x8] sm:$0xff] }
 0x2fd   :  { %913 = vmatpush.msrb.mxu3 %v2183_v46 }
 0x2fe   :  { %988 = vmatpush.msra.mxu0 %v2045_v42  ;;  %1008 = vmatpush.msra.mxu1 %v1233_v61  ;;  %v629_v42 = vld [vmem:[#allocation2 + $0x4] ss:$8 sm:$0x7] }
 0x2ff   :  { %914 = vmatpush.msrb.mxu3 %v2193_v50  ;;  %v711_v12 = vrot.slane %v629_v42, 1  ;;  %v734_v58 = vrot.slane %v629_v42, 2 }
 0x300   :  { %989 = vmatpush.msra.mxu0 %v1235_v20  ;;  %1009 = vmatpush.msra.mxu1 %v1236_v52 }
 0x301   :  { %915 = vmatpush.msrb.mxu3 %v2205_v0 }
 0x302   :  { %990 = vmatpush.msra.mxu0 %v1238_v54  ;;  %1010 = vmatpush.msra.mxu1 %v1239_v39 }
 0x35f   :  { %v667_v8 = vpop.f32.mrf.mxu0 }
 0x360   :  { %v668_v10 = vadd.f32 %v667_v8, %v2323_v30  ;;  %v687_v27 = vpop.f32.mrf.mxu1 }
 0x361   :  { %v688_v33 = vadd.f32 %v687_v27, %v1757_v55 }
 0x362   :  { %v713_v4 = vadd.f32 %v711_v12, %v668_v10 }
 0x364   :  { %v1104_v14 = vmul.f32 -1.442695, %v713_v4 }
 0x365   :  { %v647_v16 = vpop.f32.mrf.mxu3 }
 0x366   :  { %1152 = vpow2.f32 %v1104_v14  ;;  %v648_v47 = vadd.f32 %v647_v16, %v2322_v21 }
 0x368   :  { %v690_v9 = vadd.f32 %v648_v47, %v629_v42 }
 0x36a   :  { %v1103_v6 = vmul.f32 -1.442695, %v690_v9 }
 0x36c   :  { %v1153_v22 = vpop.eup %1152  ;;  %1154 = vpow2.f32 %v1103_v6 }
 0x36d   :  { %v717_v53 = vadd.f32 1.0, %v1153_v22 }
 0x36f   :  { %1156 = vrcp.f32 %v717_v53  ;;  %v729_v57 = vand.u32 2147483648, %v717_v53  ;;  %vm723_vm6 = vweird.f32 %v717_v53  ;;  %v727_v5 = vand.u32 2147483647, %v717_v53 }
 0x371   :  { %v730_v48 = vor.u32 1.1754944e-38, %v729_v57  ;;  %vm728_vm8 = vcmp.eq.f32.partialorder %v727_v5, 8.507059e+37 }
 0x372   :  { %v1155_v51 = vpop.eup %1154 }
 0x373   :  { %v694_v13 = vadd.f32 1.0, %v1155_v51 }
 0x375   :  { %1158 = vrcp.f32 %v694_v13  ;;  %v1157_v63 = vpop.eup %1156  ;;  %v706_v3 = vand.u32 2147483648, %v694_v13  ;;  %v704_v23 = vand.u32 2147483647, %v694_v13  ;;  %vm700_vm2 = vweird.f32 %v694_v13 }
 0x376   :  { %v719_v60 = vmul.f32 %v1157_v63, %v717_v53  ;;  %vm724_vm5 = vweird.f32 %v1157_v63 }
 0x377   :  { %v707_v32 = vor.u32 1.1754944e-38, %v706_v3  ;;  %vm705_vm4 = vcmp.eq.f32.partialorder %v704_v23, 8.507059e+37  ;;  %vm725_vm7 = vmor %vm723_vm6, %vm724_vm5 }
 0x378   :  { %v720_v62 = vsub.f32 1.0, %v719_v60 }
 0x37a   :  { %v721_v26 = vmul.f32 %v1157_v63, %v720_v62 }
 0x37b   :  { %v1159_v15 = vpop.eup %1158 }
 0x37c   :  { %v696_v11 = vmul.f32 %v1159_v15, %v694_v13  ;;  %vm701_vm1 = vweird.f32 %v1159_v15  ;;  %v722_v56 = vadd.f32 %v1157_v63, %v721_v26 }
 0x37d   :  { %vm702_vm3 = vmor %vm700_vm2, %vm701_vm1 }
 0x37e   :  { %v697_v19 = vsub.f32 1.0, %v696_v11  ;;  %v726_v44 = vsel %vm725_vm7, %v1157_v63, %v722_v56 }
 0x37f   :  { %v731_v59 = vsel %vm728_vm8, %v730_v48, %v726_v44 }
 0x380   :  { %v698_v18 = vmul.f32 %v1159_v15, %v697_v19  ;;  %v738_v61 = vsub.f32 1.0, %v731_v59  ;;  %v740_v54 = vmul.f32 %v731_v59, %v2059_v7  ;;  %v744_v7 = vld [vmem:[#allocation2 + $0x5] ss:$8 sm:$0x7] }
 0x381   :  { %v849_v60 = vrot.slane %v744_v7, 2 }
 0x382   :  { %v699_v29 = vadd.f32 %v1159_v15, %v698_v18 }
 0x384   :  { %v703_v35 = vsel %vm702_vm3, %v1159_v15, %v699_v29 }
 0x385   :  { %v708_v49 = vsel %vm705_vm4, %v707_v32, %v703_v35 }
 0x386   :  { %v733_v1 = vmul.f32 %v708_v49, %v688_v33  ;;  %v859_v49 = vld [vmem:[#allocation2 + $0x6] ss:$8 sm:$0x7] }
 0x387   :  { %v941_v5 = vrot.slane %v859_v49, 1 }
 0x388   :  { %v736_v41 = vadd.f32 %v734_v58, %v733_v1 }
 0x38a   :  { %1160 = vtanh.f32 %v736_v41 }
 0x390   :  { %v1161_v20 = vpop.eup %1160 }
 0x391   :  { %v739_v52 = vmul.f32 %v1161_v20, %v738_v61 }
 0x393   :  { %v2218_v39 = vadd.f32 %v740_v54, %v739_v52 }
 0x395   :  { %742 = vst [vmem:[%s2268_s6 + $0x4] sm:$0x1] %v2218_v39  ;;  %761 = vmatmul.f32.vlgmr.msra.gmra.mxu2 %v2218_v39  ;;  %781 = vmatmul.f32.vlgmr.msra.gmra.mxu3 %v2218_v39 }
 0x396   :  { %801 = vmatmul.f32.vlgmr.msrb.gmra.mxu0 %v2218_v39  ;;  %1015 = vmatpush.msra.mxu2 %v2071_v45 }
 0x398   :  { %1016 = vmatpush.msra.mxu2 %v2079_v24 }
 0x39a   :  { %1017 = vmatpush.msra.mxu2 %v2087_v2 }
 0x39c   :  { %1018 = vmatpush.msra.mxu2 %v2095_v36 }
 0x39e   :  { %1019 = vmatpush.msra.mxu2 %v2103_v17  ;;  %v826_v17 = vrot.slane %v744_v7, 1 }
 0x3a0   :  { %1020 = vmatpush.msra.mxu2 %v2111_v28 }
 0x3a2   :  { %1021 = vmatpush.msra.mxu2 %v2119_v38 }
 0x3a4   :  { %1022 = vmatpush.msra.mxu2 %v2127_v31 }
 0x3a6   :  { %1023 = vmatpush.msra.mxu2 %v2135_v25 }
 0x3a8   :  { %1024 = vmatpush.msra.mxu2 %v2143_v34 }
 0x3aa   :  { %1025 = vmatpush.msra.mxu2 %v2153_v37 }
 0x3ac   :  { %1026 = vmatpush.msra.mxu2 %v2163_v40 }
 0x3ae   :  { %1027 = vmatpush.msra.mxu2 %v2173_v43 }
 0x3b0   :  { %1028 = vmatpush.msra.mxu2 %v2183_v46 }
 0x3b2   :  { %1029 = vmatpush.msra.mxu2 %v2193_v50 }
 0x3b4   :  { %1030 = vmatpush.msra.mxu2 %v2205_v0 }
 0x413   :  { %v802_v16 = vpop.f32.mrf.mxu0 }
 0x414   :  { %v803_v22 = vadd.f32 %v802_v16, %v1757_v55 }
 0x418   :  { %v762_v45 = vpop.f32.mrf.mxu2  ;;  %v782_v24 = vpop.f32.mrf.mxu3 }
 0x419   :  { %v763_v2 = vadd.f32 %v762_v45, %v2322_v21  ;;  %v783_v36 = vadd.f32 %v782_v24, %v2323_v30 }
 0x41b   :  { %v805_v28 = vadd.f32 %v763_v2, %v744_v7  ;;  %v828_v38 = vadd.f32 %v826_v17, %v783_v36 }
 0x41d   :  { %v1105_v31 = vmul.f32 -1.442695, %v805_v28  ;;  %v1106_v25 = vmul.f32 -1.442695, %v828_v38 }
 0x41f   :  { %1162 = vpow2.f32 %v1105_v31 }
 0x420   :  { %1164 = vpow2.f32 %v1106_v25 }
 0x425   :  { %v1163_v34 = vpop.eup %1162 }
 0x426   :  { %v1165_v37 = vpop.eup %1164  ;;  %v809_v40 = vadd.f32 1.0, %v1163_v34 }
 0x427   :  { %v832_v43 = vadd.f32 1.0, %v1165_v37 }
 0x428   :  { %1166 = vrcp.f32 %v809_v40  ;;  %v821_v10 = vand.u32 2147483648, %v809_v40  ;;  %v819_v14 = vand.u32 2147483647, %v809_v40  ;;  %vm815_vm10 = vweird.f32 %v809_v40 }
 0x429   :  { %1168 = vrcp.f32 %v832_v43  ;;  %v844_v15 = vand.u32 2147483648, %v832_v43  ;;  %vm838_vm14 = vweird.f32 %v832_v43  ;;  %v842_v11 = vand.u32 2147483647, %v832_v43 }
 0x42a   :  { %v822_v6 = vor.u32 1.1754944e-38, %v821_v10  ;;  %vm820_vm12 = vcmp.eq.f32.partialorder %v819_v14, 8.507059e+37 }
 0x42b   :  { %v845_v3 = vor.u32 1.1754944e-38, %v844_v15  ;;  %vm843_vm0 = vcmp.eq.f32.partialorder %v842_v11, 8.507059e+37 }
 0x42e   :  { %v1167_v46 = vpop.eup %1166 }
 0x42f   :  { %v1169_v50 = vpop.eup %1168  ;;  %v811_v0 = vmul.f32 %v1167_v46, %v809_v40  ;;  %vm816_vm9 = vweird.f32 %v1167_v46  ;;  %v964_v40 = vrot.slane %v859_v49, 2 }
 0x430   :  { %v834_v42 = vmul.f32 %v1169_v50, %v832_v43  ;;  %vm817_vm11 = vmor %vm815_vm10, %vm816_vm9  ;;  %vm839_vm13 = vweird.f32 %v1169_v50 }
 0x431   :  { %v812_v8 = vsub.f32 1.0, %v811_v0  ;;  %vm840_vm15 = vmor %vm838_vm14, %vm839_vm13 }
 0x432   :  { %v835_v12 = vsub.f32 1.0, %v834_v42 }
 0x433   :  { %v813_v4 = vmul.f32 %v1167_v46, %v812_v8 }
 0x434   :  { %v836_v47 = vmul.f32 %v1169_v50, %v835_v12 }
 0x435   :  { %v814_v9 = vadd.f32 %v1167_v46, %v813_v4 }
 0x436   :  { %v837_v13 = vadd.f32 %v1169_v50, %v836_v47 }
 0x437   :  { %v818_v53 = vsel %vm817_vm11, %v1167_v46, %v814_v9 }
 0x438   :  { %v823_v51 = vsel %vm820_vm12, %v822_v6, %v818_v53  ;;  %v841_v19 = vsel %vm840_vm15, %v1169_v50, %v837_v13 }
 0x439   :  { %v848_v63 = vmul.f32 %v823_v51, %v803_v22  ;;  %v846_v18 = vsel %vm843_vm0, %v845_v3, %v841_v19  ;;  %v974_v22 = vld [vmem:[#allocation2 + $0x7] ss:$8 sm:$0x7] }
 0x43a   :  { %v853_v23 = vsub.f32 1.0, %v846_v18  ;;  %v855_v29 = vmul.f32 %v846_v18, %v2218_v39 }
 0x43b   :  { %v851_v62 = vadd.f32 %v849_v60, %v848_v63  ;;  %v1056_v60 = vrot.slane %v974_v22, 1 }
 0x43d   :  { %1170 = vtanh.f32 %v851_v62 }
 0x443   :  { %v1171_v26 = vpop.eup %1170 }
 0x444   :  { %v854_v27 = vmul.f32 %v1171_v26, %v853_v23 }
 0x446   :  { %v856_v32 = vadd.f32 %v855_v29, %v854_v27 }
 0x448   :  { %857 = vst [vmem:[%s2268_s6 + $0x5] sm:$0x1] %v856_v32  ;;  %876 = vmatmul.f32.vlgmr.msrb.gmra.mxu1 %v856_v32  ;;  %896 = vmatmul.f32.vlgmr.msrb.gmra.mxu2 %v856_v32 }
 0x449   :  { %916 = vmatmul.f32.vlgmr.msrb.gmra.mxu3 %v856_v32 }
 0x4c5   :  { %v877_v33 = vpop.f32.mrf.mxu1 }
 0x4c6   :  { %v878_v35 = vadd.f32 %v877_v33, %v2322_v21 }
 0x4c8   :  { %v920_v56 = vadd.f32 %v878_v35, %v859_v49 }
 0x4ca   :  { %v1107_v57 = vmul.f32 -1.442695, %v920_v56 }
 0x4cb   :  { %v897_v58 = vpop.f32.mrf.mxu2 }
 0x4cc   :  { %1172 = vpow2.f32 %v1107_v57  ;;  %v898_v1 = vadd.f32 %v897_v58, %v2323_v30  ;;  %v917_v36 = vpop.f32.mrf.mxu3 }
 0x4cd   :  { %v918_v25 = vadd.f32 %v917_v36, %v1757_v55 }
 0x4ce   :  { %v943_v41 = vadd.f32 %v941_v5, %v898_v1 }
 0x4d0   :  { %v1108_v44 = vmul.f32 -1.442695, %v943_v41 }
 0x4d2   :  { %v1173_v48 = vpop.eup %1172  ;;  %1174 = vpow2.f32 %v1108_v44 }
 0x4d3   :  { %v924_v59 = vadd.f32 1.0, %v1173_v48 }
 0x4d5   :  { %1176 = vrcp.f32 %v924_v59  ;;  %v936_v7 = vand.u32 2147483648, %v924_v59  ;;  %v934_v24 = vand.u32 2147483647, %v924_v59  ;;  %vm930_vm2 = vweird.f32 %v924_v59 }
 0x4d7   :  { %v937_v38 = vor.u32 1.1754944e-38, %v936_v7  ;;  %vm935_vm4 = vcmp.eq.f32.partialorder %v934_v24, 8.507059e+37 }
 0x4d8   :  { %v1175_v61 = vpop.eup %1174 }
 0x4d9   :  { %v947_v20 = vadd.f32 1.0, %v1175_v61 }
 0x4db   :  { %v1177_v52 = vpop.eup %1176  ;;  %1178 = vrcp.f32 %v947_v20  ;;  %v959_v46 = vand.u32 2147483648, %v947_v20  ;;  %v957_v0 = vand.u32 2147483647, %v947_v20  ;;  %vm953_vm6 = vweird.f32 %v947_v20 }
 0x4dc   :  { %v926_v54 = vmul.f32 %v1177_v52, %v924_v59  ;;  %vm931_vm1 = vweird.f32 %v1177_v52 }
 0x4dd   :  { %vm932_vm3 = vmor %vm930_vm2, %vm931_vm1  ;;  %v960_v10 = vor.u32 1.1754944e-38, %v959_v46  ;;  %vm958_vm8 = vcmp.eq.f32.partialorder %v957_v0, 8.507059e+37 }
 0x4de   :  { %v927_v39 = vsub.f32 1.0, %v926_v54 }
 0x4e0   :  { %v928_v45 = vmul.f32 %v1177_v52, %v927_v39 }
 0x4e1   :  { %v1179_v2 = vpop.eup %1178 }
 0x4e2   :  { %v949_v17 = vmul.f32 %v1179_v2, %v947_v20  ;;  %v929_v28 = vadd.f32 %v1177_v52, %v928_v45  ;;  %vm954_vm5 = vweird.f32 %v1179_v2 }
 0x4e3   :  { %vm955_vm7 = vmor %vm953_vm6, %vm954_vm5 }
 0x4e4   :  { %v950_v31 = vsub.f32 1.0, %v949_v17  ;;  %v933_v34 = vsel %vm932_vm3, %v1177_v52, %v929_v28  ;;  %v1079_v52 = vrot.slane %v974_v22, 2 }
 0x4e5   :  { %v938_v37 = vsel %vm935_vm4, %v937_v38, %v933_v34 }
 0x4e6   :  { %v951_v43 = vmul.f32 %v1179_v2, %v950_v31  ;;  %v963_v50 = vmul.f32 %v938_v37, %v918_v25 }
 0x4e8   :  { %v952_v42 = vadd.f32 %v1179_v2, %v951_v43  ;;  %v966_v8 = vadd.f32 %v964_v40, %v963_v50 }
 0x4ea   :  { %v956_v12 = vsel %vm955_vm7, %v1179_v2, %v952_v42  ;;  %1180 = vtanh.f32 %v966_v8 }
 0x4eb   :  { %v961_v4 = vsel %vm958_vm8, %v960_v10, %v956_v12 }
 0x4ec   :  { %v968_v14 = vsub.f32 1.0, %v961_v4  ;;  %v970_v9 = vmul.f32 %v961_v4, %v856_v32 }
 0x4f0   :  { %v1181_v16 = vpop.eup %1180 }
 0x4f1   :  { %v969_v47 = vmul.f32 %v1181_v16, %v968_v14 }
 0x4f3   :  { %v971_v6 = vadd.f32 %v970_v9, %v969_v47 }
 0x4f5   :  { %972 = vst [vmem:[%s2268_s6 + $0x6] sm:$0x1] %v971_v6  ;;  %991 = vmatmul.f32.vlgmr.msra.gmra.mxu0 %v971_v6  ;;  %1011 = vmatmul.f32.vlgmr.msra.gmra.mxu1 %v971_v6 }
 0x4f6   :  { %1031 = vmatmul.f32.vlgmr.msra.gmra.mxu2 %v971_v6 }
 0x572   :  { %v992_v53 = vpop.f32.mrf.mxu0  ;;  %v1012_v51 = vpop.f32.mrf.mxu1 }
 0x573   :  { %v993_v13 = vadd.f32 %v992_v53, %v2322_v21  ;;  %v1013_v63 = vadd.f32 %v1012_v51, %v2323_v30 }
 0x575   :  { %v1035_v15 = vadd.f32 %v993_v13, %v974_v22  ;;  %v1058_v11 = vadd.f32 %v1056_v60, %v1013_v63 }
 0x577   :  { %v1109_v62 = vmul.f32 -1.442695, %v1035_v15  ;;  %v1110_v19 = vmul.f32 -1.442695, %v1058_v11 }
 0x579   :  { %1182 = vpow2.f32 %v1109_v62  ;;  %v1032_v58 = vpop.f32.mrf.mxu2 }
 0x57a   :  { %1184 = vpow2.f32 %v1110_v19  ;;  %v1033_v41 = vadd.f32 %v1032_v58, %v1757_v55 }
 0x57f   :  { %v1183_v3 = vpop.eup %1182 }
 0x580   :  { %v1185_v18 = vpop.eup %1184  ;;  %v1039_v23 = vadd.f32 1.0, %v1183_v3 }
 0x581   :  { %v1062_v26 = vadd.f32 1.0, %v1185_v18 }
 0x582   :  { %1186 = vrcp.f32 %v1039_v23  ;;  %v1051_v30 = vand.u32 2147483648, %v1039_v23  ;;  %v1049_v56 = vand.u32 2147483647, %v1039_v23  ;;  %vm1045_vm10 = vweird.f32 %v1039_v23 }
 0x583   :  { %1188 = vrcp.f32 %v1062_v26  ;;  %v1074_v61 = vand.u32 2147483648, %v1062_v26  ;;  %vm1068_vm14 = vweird.f32 %v1062_v26  ;;  %v1072_v54 = vand.u32 2147483647, %v1062_v26 }
 0x584   :  { %v1052_v5 = vor.u32 1.1754944e-38, %v1051_v30  ;;  %vm1050_vm12 = vcmp.eq.f32.partialorder %v1049_v56, 8.507059e+37 }
 0x585   :  { %v1075_v45 = vor.u32 1.1754944e-38, %v1074_v61  ;;  %vm1073_vm0 = vcmp.eq.f32.partialorder %v1072_v54, 8.507059e+37 }
 0x588   :  { %v1187_v27 = vpop.eup %1186 }
 0x589   :  { %v1189_v29 = vpop.eup %1188  ;;  %v1041_v32 = vmul.f32 %v1187_v27, %v1039_v23  ;;  %vm1046_vm9 = vweird.f32 %v1187_v27 }
 0x58a   :  { %v1064_v33 = vmul.f32 %v1189_v29, %v1062_v26  ;;  %vm1047_vm11 = vmor %vm1045_vm10, %vm1046_vm9  ;;  %vm1069_vm13 = vweird.f32 %v1189_v29 }
 0x58b   :  { %v1042_v21 = vsub.f32 1.0, %v1041_v32  ;;  %vm1070_vm15 = vmor %vm1068_vm14, %vm1069_vm13 }
 0x58c   :  { %v1065_v35 = vsub.f32 1.0, %v1064_v33 }
 0x58d   :  { %v1043_v49 = vmul.f32 %v1187_v27, %v1042_v21 }
 0x58e   :  { %v1066_v57 = vmul.f32 %v1189_v29, %v1065_v35 }
 0x58f   :  { %v1044_v1 = vadd.f32 %v1187_v27, %v1043_v49 }
 0x590   :  { %v1067_v59 = vadd.f32 %v1189_v29, %v1066_v57 }
 0x591   :  { %v1048_v44 = vsel %vm1047_vm11, %v1187_v27, %v1044_v1 }
 0x592   :  { %v1053_v48 = vsel %vm1050_vm12, %v1052_v5, %v1048_v44  ;;  %v1071_v7 = vsel %vm1070_vm15, %v1189_v29, %v1067_v59 }
 0x593   :  { %v1078_v20 = vmul.f32 %v1053_v48, %v1033_v41  ;;  %v1076_v24 = vsel %vm1073_vm0, %v1075_v45, %v1071_v7 }
 0x594   :  { %v1083_v2 = vsub.f32 1.0, %v1076_v24  ;;  %v1085_v17 = vmul.f32 %v1076_v24, %v971_v6 }
 0x595   :  { %v1081_v39 = vadd.f32 %v1079_v52, %v1078_v20 }
 0x597   :  { %1190 = vtanh.f32 %v1081_v39 }
 0x59d   :  { %v1191_v36 = vpop.eup %1190 }
 0x59e   :  { %v1084_v55 = vmul.f32 %v1191_v36, %v1083_v2 }
 0x5a0   :  { %v1086_v28 = vadd.f32 %v1085_v17, %v1084_v55 }
 0x5a2   :  { %1087 = vst [vmem:[%s2268_s6 + $0x7] sm:$0x1] %v1086_v28 }

</bundles_post_ra>
